<compile_context>
chip_gen: v5e
topology: v5e:2x2
jax: 0.10.0
libtpu: 0.0.40
codegen_flags: <defaults>
</compile_context>

<pallas_src>
import random
from functools import partial

import jax
import jax.numpy as jnp
from jax import lax
from jax.experimental import pallas as pl
from jax.experimental.pallas import tpu as pltpu

N_LAYERS = 2  # fixed to 2, as in the reference module


# ------------------------------ shared helpers ------------------------------

def _lstm_gates(gates, c_prev, H):
    """PyTorch gate order (i, f, g, o). gates: (B, 4H) with 128-lane slices."""
    i = jax.nn.sigmoid(gates[:, 0 * H:1 * H])
    f = jax.nn.sigmoid(gates[:, 1 * H:2 * H])
    g = jnp.tanh(gates[:, 2 * H:3 * H])
    o = jax.nn.sigmoid(gates[:, 3 * H:4 * H])
    c_new = f * c_prev + i * g
    h_new = o * jnp.tanh(c_new)
    return h_new, c_new


def _resident(arr):
    """Full-array VMEM block with a constant index map (DMA'd once, stays resident)."""
    nd = arr.ndim
    return pl.BlockSpec(tuple(arr.shape), lambda *_: (0,) * nd)


def _resident_shape(shape):
    nd = len(shape)
    return pl.BlockSpec(tuple(shape), lambda *_: (0,) * nd)


# ------------------------------ encoder kernel ------------------------------

def encoder_kernel(src_ref, emb_ref, wih0_ref, b0_ref, whh0_ref,
                   w1_ref, b1_ref, h_out_ref, c_out_ref, xproj_scr,
                   *, B, H, SB, VIN_PAD):
    s = pl.program_id(0)

    @pl.when(s == 0)
    def _init():
        # Embedding lookup (one-hot matmul) + layer-0 input projection for the
        # WHOLE source sequence in two batched MXU matmuls; bias folded in once.
        tok = src_ref[...]                                         # (SB, 1) i32
        io = lax.broadcasted_iota(jnp.int32, (SB, VIN_PAD), 1)
        onehot = (io == tok).astype(jnp.float32)                   # (SB, Vp)
        ex = jnp.dot(onehot, emb_ref[...],
                     preferred_element_type=jnp.float32)           # (SB, E)
        xproj_scr[...] = (jnp.dot(ex, wih0_ref[...],
                                  preferred_element_type=jnp.float32)
                          + b0_ref[...])                           # (SB, 4H)
        h_out_ref[...] = jnp.zeros_like(h_out_ref)
        c_out_ref[...] = jnp.zeros_like(c_out_ref)

    row = pl.multiple_of(s * B, B)
    xg = xproj_scr[pl.ds(row, B), :]                               # (B, 4H)

    # layer 0: input projection precomputed, only h @ W_hh on the serial path.
    h0 = h_out_ref[0]
    c0 = c_out_ref[0]
    g0 = xg + jnp.dot(h0, whh0_ref[...], preferred_element_type=jnp.float32)
    h0n, c0n = _lstm_gates(g0, c0, H)

    # layer 1: single fused [x, h] @ [W_ih; W_hh] matmul.
    h1 = h_out_ref[1]
    c1 = c_out_ref[1]
    z1 = jnp.concatenate([h0n, h1], axis=1)                        # (B, 2H)
    g1 = (jnp.dot(z1, w1_ref[...], preferred_element_type=jnp.float32)
          + b1_ref[...])
    h1n, c1n = _lstm_gates(g1, c1, H)

    # state lives in the resident output blocks (constant index map).
    h_out_ref[0] = h0n
    c_out_ref[0] = c0n
    h_out_ref[1] = h1n
    c_out_ref[1] = c1n


def encoder_forward(params, src, *, B, H, src_len, vin_pad):
    SB = src_len * B
    src_col = src.reshape(SB, 1).astype(jnp.int32)

    inputs = (src_col, params["enc_emb"], params["enc_wih0"], params["enc_b0"],
              params["enc_whh0"], params["enc_w1"], params["enc_b1"])

    grid_spec = pltpu.PrefetchScalarGridSpec(
        num_scalar_prefetch=0,
        grid=(src_len,),
        in_specs=[_resident(a) for a in inputs],
        out_specs=(_resident_shape((N_LAYERS, B, H)),
                   _resident_shape((N_LAYERS, B, H))),
        scratch_shapes=[pltpu.VMEM((SB, 4 * H), jnp.float32)],
    )
    hidden, cell = pl.pallas_call(
        partial(encoder_kernel, B=B, H=H, SB=SB, VIN_PAD=vin_pad),
        out_shape=(jax.ShapeDtypeStruct((N_LAYERS, B, H), jnp.float32),
                   jax.ShapeDtypeStruct((N_LAYERS, B, H), jnp.float32)),
        grid_spec=grid_spec,
        compiler_params=pltpu.CompilerParams(
            dimension_semantics=("arbitrary",)),
    )(*inputs)
    return hidden, cell


# ------------------------------ decoder kernel ------------------------------

def decoder_kernel(tf_ref, trg_ref, h_init_ref, c_init_ref, emb_ref,
                   w0_ref, b0_ref, w1_ref, b1_ref, fcw_ref, fcb_ref,
                   out_ref, h_scr, c_scr, top1_scr,
                   *, B, H, VOUT, VOUT_PAD):
    s = pl.program_id(0)

    @pl.when(s == 0)
    def _init():
        h_scr[...] = h_init_ref[...]
        c_scr[...] = c_init_ref[...]
        top1_scr[...] = jnp.zeros_like(top1_scr)

    # --- choose input token: teacher forcing vs previous greedy argmax -------
    tf = tf_ref[s]                                   # scalar int32 from SMEM
    tok_tf = trg_ref[0]                              # (B, 1) int32
    tok = jnp.where(tf > 0, tok_tf, top1_scr[...])   # (B, 1) int32

    # --- embedding lookup as one-hot matmul ----------------------------------
    v_iota = lax.broadcasted_iota(jnp.int32, (B, VOUT_PAD), 1)
    onehot = (v_iota == tok).astype(jnp.float32)     # (B, V_pad)
    x = jnp.dot(onehot, emb_ref[...], preferred_element_type=jnp.float32)

    # --- 2-layer LSTM cell, one fused [x, h] @ [W_ih; W_hh] matmul per layer --
    h0 = h_scr[0]
    c0 = c_scr[0]
    z0 = jnp.concatenate([x, h0], axis=1)            # (B, E + H)
    g0 = (jnp.dot(z0, w0_ref[...], preferred_element_type=jnp.float32)
          + b0_ref[...])
    h0n, c0n = _lstm_gates(g0, c0, H)

    h1 = h_scr[1]
    c1 = c_scr[1]
    z1 = jnp.concatenate([h0n, h1], axis=1)          # (B, 2H)
    g1 = (jnp.dot(z1, w1_ref[...], preferred_element_type=jnp.float32)
          + b1_ref[...])
    h1n, c1n = _lstm_gates(g1, c1, H)

    h_scr[0] = h0n
    c_scr[0] = c0n
    h_scr[1] = h1n
    c_scr[1] = c1n

    # --- fc_out (lane-dense: vocab padded to 128) -----------------------------
    pred = (jnp.dot(h1n, fcw_ref[...], preferred_element_type=jnp.float32)
            + fcb_ref[...])                          # (B, V_pad)
    out_ref[0] = pred

    # --- greedy argmax over the real vocab (first-index tie-break) ------------
    neg = jnp.float32(-1e30)
    masked = jnp.where(v_iota < VOUT, pred, neg)
    m = jnp.max(masked, axis=1, keepdims=True)
    cand = jnp.where(masked == m, v_iota, VOUT_PAD)
    top1_scr[...] = jnp.min(cand, axis=1, keepdims=True).astype(jnp.int32)


def decoder_forward(params, trg_in, tf_vec, hidden, cell, *, B, H,
                    trg_len, vout, vout_pad):
    steps = trg_len - 1
    trg3 = trg_in.reshape(steps, B, 1).astype(jnp.int32)

    resident_in = (hidden, cell, params["dec_emb"], params["dec_w0"],
                   params["dec_b0"], params["dec_w1"], params["dec_b1"],
                   params["fc_w"], params["fc_b"])

    in_specs = ([pl.BlockSpec((1, B, 1), lambda s, tf: (s, 0, 0))]
                + [_resident(a) for a in resident_in])
    out_spec = pl.BlockSpec((1, B, vout_pad), lambda s, tf: (s, 0, 0))

    grid_spec = pltpu.PrefetchScalarGridSpec(
        num_scalar_prefetch=1,
        grid=(steps,),
        in_specs=in_specs,
        out_specs=out_spec,
        scratch_shapes=[pltpu.VMEM((N_LAYERS, B, H), jnp.float32),
                        pltpu.VMEM((N_LAYERS, B, H), jnp.float32),
                        pltpu.VMEM((B, 1), jnp.int32)],
    )
    preds = pl.pallas_call(
        partial(decoder_kernel, B=B, H=H, VOUT=vout, VOUT_PAD=vout_pad),
        out_shape=jax.ShapeDtypeStruct((steps, B, vout_pad), jnp.float32),
        grid_spec=grid_spec,
        compiler_params=pltpu.CompilerParams(
            dimension_semantics=("arbitrary",)),
    )(tf_vec, trg3, *resident_in)
    return preds


# ------------------------------- model glue ---------------------------------

def init_params(key, input_dim, output_dim, emb_dim, hidden_dim,
                vin_pad, vout_pad):
    """Synthetic params, pre-packed for the kernels.

    Gate order is PyTorch's (i, f, g, o); biases are the combined b_ih + b_hh.
    Layer-1 / decoder weights are packed as [W_ih; W_hh] for a single matmul.
    Embedding / fc_out vocab dims are padded to 128 lanes (padding is zero).
    """
    def u(k, shape, scale=0.1):
        return jax.random.uniform(k, shape, jnp.float32, -scale, scale)

    ks = iter(jax.random.split(key, 16))
    H4 = 4 * hidden_dim
    params = {}

    emb = u(next(ks), (input_dim, emb_dim))
    params["enc_emb"] = (jnp.zeros((vin_pad, emb_dim), jnp.float32)
                         .at[:input_dim].set(emb))
    params["enc_wih0"] = u(next(ks), (emb_dim, H4))
    params["enc_whh0"] = u(next(ks), (hidden_dim, H4))
    params["enc_b0"] = u(next(ks), (1, H4))
    params["enc_w1"] = u(next(ks), (2 * hidden_dim, H4))
    params["enc_b1"] = u(next(ks), (1, H4))

    demb = u(next(ks), (output_dim, emb_dim))
    params["dec_emb"] = (jnp.zeros((vout_pad, emb_dim), jnp.float32)
                         .at[:output_dim].set(demb))
    params["dec_w0"] = u(next(ks), (emb_dim + hidden_dim, H4))
    params["dec_b0"] = u(next(ks), (1, H4))
    params["dec_w1"] = u(next(ks), (2 * hidden_dim, H4))
    params["dec_b1"] = u(next(ks), (1, H4))
    fc_w = u(next(ks), (hidden_dim, output_dim))
    fc_b = u(next(ks), (1, output_dim))
    params["fc_w"] = (jnp.zeros((hidden_dim, vout_pad), jnp.float32)
                      .at[:, :output_dim].set(fc_w))
    params["fc_b"] = (jnp.zeros((1, vout_pad), jnp.float32)
                      .at[:, :output_dim].set(fc_b))
    return params


def seq2seq_forward(params, src, trg, teacher_forcing_ratio, *, hidden_dim,
                    output_dim, vin_pad, vout_pad, tf_seed=0):
    trg_len, B = trg.shape
    src_len = src.shape[0]

    # TODO(synk): dropout is identity here (eval-mode forward).
    hidden, cell = encoder_forward(params, src, B=B, H=hidden_dim,
                                   src_len=src_len, vin_pad=vin_pad)

    # Deterministic host-side teacher-forcing draws (mirrors the reference's
    # python random.random() < ratio); decoder step 0 always uses trg[0].
    rng = random.Random(tf_seed)
    draws = [1 if rng.random() < teacher_forcing_ratio else 0
             for _ in range(1, trg_len)]
    tf_vec = jnp.asarray([1] + draws[:-1], dtype=jnp.int32)  # len = trg_len-1

    preds = decoder_forward(params, trg[:-1], tf_vec, hidden, cell,
                            B=B, H=hidden_dim, trg_len=trg_len,
                            vout=output_dim, vout_pad=vout_pad)

    outputs = jnp.concatenate(
        [jnp.zeros((1, B, output_dim), jnp.float32),      # outputs[0] stays 0
         preds[:, :, :output_dim]], axis=0)
    return outputs


# ----------------------------------- main ------------------------------------

if __name__ == "__main__":
    # Small shapes consistent with the module (scaled down from 512/256/vocab),
    # but with H = 128 so gate slices and output stores are 128-lane aligned.
    INPUT_DIM = 20        # vi vocab size
    OUTPUT_DIM = 24       # en vocab size
    EMB_DIM = 128
    HIDDEN_DIM = 128
    SRC_LEN = 6
    TRG_LEN = 5
    BATCH = 8
    TEACHER_FORCING_RATIO = 0.5
    VIN_PAD = 128
    VOUT_PAD = 128

    key = jax.random.PRNGKey(0)
    kp, ks, kt = jax.random.split(key, 3)

    params = init_params(kp, INPUT_DIM, OUTPUT_DIM, EMB_DIM, HIDDEN_DIM,
                         VIN_PAD, VOUT_PAD)

    src = jax.random.randint(ks, (SRC_LEN, BATCH), 0, INPUT_DIM, jnp.int32)
    trg = jax.random.randint(kt, (TRG_LEN, BATCH), 0, OUTPUT_DIM, jnp.int32)

    outputs = seq2seq_forward(params, src, trg, TEACHER_FORCING_RATIO,
                              hidden_dim=HIDDEN_DIM, output_dim=OUTPUT_DIM,
                              vin_pad=VIN_PAD, vout_pad=VOUT_PAD)
    outputs = jax.block_until_ready(outputs)

    assert outputs.shape == (TRG_LEN, BATCH, OUTPUT_DIM)
    assert outputs.dtype == jnp.float32
    assert bool(jnp.all(outputs[0] == 0.0))  # outputs[0] is never written
    assert bool(jnp.all(jnp.isfinite(outputs)))
    print("KERNEL_OK")
</pallas_src>

<mosaic_0001>
module attributes {stable_mosaic.version = 11 : i64} {
  func.func @encoder_kernel(%arg0: i32, %arg1: memref<48x1xi32, #tpu.memory_space<vmem>>, %arg2: memref<128x128xf32, #tpu.memory_space<vmem>>, %arg3: memref<128x512xf32, #tpu.memory_space<vmem>>, %arg4: memref<1x512xf32, #tpu.memory_space<vmem>>, %arg5: memref<128x512xf32, #tpu.memory_space<vmem>>, %arg6: memref<256x512xf32, #tpu.memory_space<vmem>>, %arg7: memref<1x512xf32, #tpu.memory_space<vmem>>, %arg8: memref<2x8x128xf32, #tpu.memory_space<vmem>>, %arg9: memref<2x8x128xf32, #tpu.memory_space<vmem>>, %arg10: memref<48x512xf32, #tpu.memory_space<vmem>>) attributes {dimension_semantics = [#tpu.dimension_semantics<arbitrary>], iteration_bounds = array<i64: 6>, scalar_prefetch = 0 : i64, scratch_operands = 1 : i64, tpu.core_type = #tpu.core_type<tc>, window_params = [{pipeline_mode = #tpu.pipeline_mode<synchronous>, transform_indices = @transform_0, window_bounds = array<i64: 48, 1>}, {pipeline_mode = #tpu.pipeline_mode<synchronous>, transform_indices = @transform_1, window_bounds = array<i64: 128, 128>}, {pipeline_mode = #tpu.pipeline_mode<synchronous>, transform_indices = @transform_2, window_bounds = array<i64: 128, 512>}, {pipeline_mode = #tpu.pipeline_mode<synchronous>, transform_indices = @transform_3, window_bounds = array<i64: 1, 512>}, {pipeline_mode = #tpu.pipeline_mode<synchronous>, transform_indices = @transform_4, window_bounds = array<i64: 128, 512>}, {pipeline_mode = #tpu.pipeline_mode<synchronous>, transform_indices = @transform_5, window_bounds = array<i64: 256, 512>}, {pipeline_mode = #tpu.pipeline_mode<synchronous>, transform_indices = @transform_6, window_bounds = array<i64: 1, 512>}, {pipeline_mode = #tpu.pipeline_mode<synchronous>, transform_indices = @transform_7, window_bounds = array<i64: 2, 8, 128>}, {pipeline_mode = #tpu.pipeline_mode<synchronous>, transform_indices = @transform_8, window_bounds = array<i64: 2, 8, 128>}]} {
    %c0_i32 = arith.constant 0 : i32
    %0 = arith.cmpi eq, %arg0, %c0_i32 : i32
    %1 = arith.extui %0 : i1 to i32
    %c0_i32_0 = arith.constant 0 : i32
    %2 = arith.cmpi ne, %1, %c0_i32_0 : i32
    scf.if %2 {
      %c0_37 = arith.constant 0 : index
      %c0_38 = arith.constant 0 : index
      %86 = vector.load %arg1[%c0_37, %c0_38] : memref<48x1xi32, #tpu.memory_space<vmem>>, vector<48x1xi32>
      %87 = tpu.iota {dimensions = array<i32: 1>} : vector<48x128xi32>
      %88 = vector.broadcast %86 : vector<48x1xi32> to vector<48x128xi32>
      %89 = arith.cmpi eq, %87, %88 : vector<48x128xi32>
      %90 = arith.extui %89 : vector<48x128xi1> to vector<48x128xi32>
      %91 = arith.sitofp %90 : vector<48x128xi32> to vector<48x128xf32>
      %c0_39 = arith.constant 0 : index
      %c0_40 = arith.constant 0 : index
      %92 = vector.load %arg2[%c0_39, %c0_40] : memref<128x128xf32, #tpu.memory_space<vmem>>, vector<128x128xf32>
      %cst_41 = arith.constant dense<0.000000e+00> : vector<48x128xf32>
      %93 = tpu.matmul %91, %92, %cst_41 {dimension_numbers = #tpu.dot_dimension_numbers<[1], [0], [0], [1], [0, 0, 1, 1], [], []>} : vector<48x128xf32>, vector<128x128xf32>, vector<48x128xf32> -> vector<48x128xf32>
      %c0_42 = arith.constant 0 : index
      %c0_43 = arith.constant 0 : index
      %94 = vector.load %arg3[%c0_42, %c0_43] : memref<128x512xf32, #tpu.memory_space<vmem>>, vector<128x512xf32>
      %cst_44 = arith.constant dense<0.000000e+00> : vector<48x512xf32>
      %95 = tpu.matmul %93, %94, %cst_44 {dimension_numbers = #tpu.dot_dimension_numbers<[1], [0], [0], [1], [0, 0, 1, 1], [], []>} : vector<48x128xf32>, vector<128x512xf32>, vector<48x512xf32> -> vector<48x512xf32>
      %c0_45 = arith.constant 0 : index
      %c0_46 = arith.constant 0 : index
      %96 = vector.load %arg4[%c0_45, %c0_46] : memref<1x512xf32, #tpu.memory_space<vmem>>, vector<1x512xf32>
      %97 = vector.broadcast %96 : vector<1x512xf32> to vector<48x512xf32>
      %98 = arith.addf %95, %97 : vector<48x512xf32>
      %c0_47 = arith.constant 0 : index
      %c0_48 = arith.constant 0 : index
      %99 = vector.load %arg10[%c0_47, %c0_48] : memref<48x512xf32, #tpu.memory_space<vmem>>, vector<48x512xf32>
      tpu.vector_store %arg10[%c0_47, %c0_48], %98 {strides = array<i32>} : memref<48x512xf32, #tpu.memory_space<vmem>>, vector<48x512xf32>,
      %cst_49 = arith.constant 0.000000e+00 : f32
      %100 = vector.broadcast %cst_49 : f32 to vector<2x8x128xf32>
      %c0_50 = arith.constant 0 : index
      %c0_51 = arith.constant 0 : index
      %c0_52 = arith.constant 0 : index
      %101 = vector.load %arg8[%c0_50, %c0_51, %c0_52] : memref<2x8x128xf32, #tpu.memory_space<vmem>>, vector<2x8x128xf32>
      tpu.vector_store %arg8[%c0_50, %c0_51, %c0_52], %100 {strides = array<i32>} : memref<2x8x128xf32, #tpu.memory_space<vmem>>, vector<2x8x128xf32>,
      %cst_53 = arith.constant 0.000000e+00 : f32
      %102 = vector.broadcast %cst_53 : f32 to vector<2x8x128xf32>
      %c0_54 = arith.constant 0 : index
      %c0_55 = arith.constant 0 : index
      %c0_56 = arith.constant 0 : index
      %103 = vector.load %arg9[%c0_54, %c0_55, %c0_56] : memref<2x8x128xf32, #tpu.memory_space<vmem>>, vector<2x8x128xf32>
      tpu.vector_store %arg9[%c0_54, %c0_55, %c0_56], %102 {strides = array<i32>} : memref<2x8x128xf32, #tpu.memory_space<vmem>>, vector<2x8x128xf32>,
    } else {
    }
    %c8_i32 = arith.constant 8 : i32
    %3 = arith.muli %arg0, %c8_i32 : i32
    %4 = tpu.assume_multiple %3, 8 : i32
    %5 = arith.index_cast %4 : i32 to index
    %c0 = arith.constant 0 : index
    %6 = vector.load %arg10[%5, %c0] : memref<48x512xf32, #tpu.memory_space<vmem>>, vector<8x512xf32>
    %c0_1 = arith.constant 0 : index
    %c0_2 = arith.constant 0 : index
    %c0_3 = arith.constant 0 : index
    %7 = vector.load %arg8[%c0_1, %c0_2, %c0_3] : memref<2x8x128xf32, #tpu.memory_space<vmem>>, vector<1x8x128xf32>
    %8 = vector.shape_cast %7 : vector<1x8x128xf32> to vector<8x128xf32>
    %c0_4 = arith.constant 0 : index
    %c0_5 = arith.constant 0 : index
    %c0_6 = arith.constant 0 : index
    %9 = vector.load %arg9[%c0_4, %c0_5, %c0_6] : memref<2x8x128xf32, #tpu.memory_space<vmem>>, vector<1x8x128xf32>
    %10 = vector.shape_cast %9 : vector<1x8x128xf32> to vector<8x128xf32>
    %c0_7 = arith.constant 0 : index
    %c0_8 = arith.constant 0 : index
    %11 = vector.load %arg5[%c0_7, %c0_8] : memref<128x512xf32, #tpu.memory_space<vmem>>, vector<128x512xf32>
    %cst = arith.constant dense<0.000000e+00> : vector<8x512xf32>
    %12 = tpu.matmul %8, %11, %cst {dimension_numbers = #tpu.dot_dimension_numbers<[1], [0], [0], [1], [0, 0, 1, 1], [], []>} : vector<8x128xf32>, vector<128x512xf32>, vector<8x512xf32> -> vector<8x512xf32>
    %13 = arith.addf %6, %12 : vector<8x512xf32>
    %14 = vector.extract_strided_slice %13 {offsets = [0, 0], sizes = [8, 128], strides = [1, 1]} : vector<8x512xf32> to vector<8x128xf32>
    %15 = arith.negf %14 : vector<8x128xf32>
    %16 = math.exp %15 : vector<8x128xf32>
    %cst_9 = arith.constant 1.000000e+00 : f32
    %17 = vector.broadcast %cst_9 : f32 to vector<8x128xf32>
    %18 = arith.addf %17, %16 : vector<8x128xf32>
    %19 = arith.divf %17, %18 : vector<8x128xf32>
    %20 = vector.extract_strided_slice %13 {offsets = [0, 128], sizes = [8, 128], strides = [1, 1]} : vector<8x512xf32> to vector<8x128xf32>
    %21 = arith.negf %20 : vector<8x128xf32>
    %22 = math.exp %21 : vector<8x128xf32>
    %cst_10 = arith.constant 1.000000e+00 : f32
    %23 = vector.broadcast %cst_10 : f32 to vector<8x128xf32>
    %24 = arith.addf %23, %22 : vector<8x128xf32>
    %25 = arith.divf %23, %24 : vector<8x128xf32>
    %26 = vector.extract_strided_slice %13 {offsets = [0, 256], sizes = [8, 128], strides = [1, 1]} : vector<8x512xf32> to vector<8x128xf32>
    %27 = math.tanh %26 : vector<8x128xf32>
    %28 = vector.extract_strided_slice %13 {offsets = [0, 384], sizes = [8, 128], strides = [1, 1]} : vector<8x512xf32> to vector<8x128xf32>
    %29 = arith.negf %28 : vector<8x128xf32>
    %30 = math.exp %29 : vector<8x128xf32>
    %cst_11 = arith.constant 1.000000e+00 : f32
    %31 = vector.broadcast %cst_11 : f32 to vector<8x128xf32>
    %32 = arith.addf %31, %30 : vector<8x128xf32>
    %33 = arith.divf %31, %32 : vector<8x128xf32>
    %34 = arith.mulf %25, %10 : vector<8x128xf32>
    %35 = arith.mulf %19, %27 : vector<8x128xf32>
    %36 = arith.addf %34, %35 : vector<8x128xf32>
    %37 = math.tanh %36 : vector<8x128xf32>
    %38 = arith.mulf %33, %37 : vector<8x128xf32>
    %c1 = arith.constant 1 : index
    %c0_12 = arith.constant 0 : index
    %c0_13 = arith.constant 0 : index
    %39 = vector.load %arg8[%c1, %c0_12, %c0_13] : memref<2x8x128xf32, #tpu.memory_space<vmem>>, vector<1x8x128xf32>
    %40 = vector.shape_cast %39 : vector<1x8x128xf32> to vector<8x128xf32>
    %c1_14 = arith.constant 1 : index
    %c0_15 = arith.constant 0 : index
    %c0_16 = arith.constant 0 : index
    %41 = vector.load %arg9[%c1_14, %c0_15, %c0_16] : memref<2x8x128xf32, #tpu.memory_space<vmem>>, vector<1x8x128xf32>
    %42 = vector.shape_cast %41 : vector<1x8x128xf32> to vector<8x128xf32>
    %43 = tpu.concatenate %38, %40 in 1 : vector<8x128xf32>, vector<8x128xf32> -> vector<8x256xf32>
    %c0_17 = arith.constant 0 : index
    %c0_18 = arith.constant 0 : index
    %44 = vector.load %arg6[%c0_17, %c0_18] : memref<256x512xf32, #tpu.memory_space<vmem>>, vector<256x512xf32>
    %cst_19 = arith.constant dense<0.000000e+00> : vector<8x512xf32>
    %45 = tpu.matmul %43, %44, %cst_19 {dimension_numbers = #tpu.dot_dimension_numbers<[1], [0], [0], [1], [0, 0, 1, 1], [], []>} : vector<8x256xf32>, vector<256x512xf32>, vector<8x512xf32> -> vector<8x512xf32>
    %c0_20 = arith.constant 0 : index
    %c0_21 = arith.constant 0 : index
    %46 = vector.load %arg7[%c0_20, %c0_21] : memref<1x512xf32, #tpu.memory_space<vmem>>, vector<1x512xf32>
    %47 = vector.broadcast %46 : vector<1x512xf32> to vector<8x512xf32>
    %48 = arith.addf %45, %47 : vector<8x512xf32>
    %49 = vector.extract_strided_slice %48 {offsets = [0, 0], sizes = [8, 128], strides = [1, 1]} : vector<8x512xf32> to vector<8x128xf32>
    %50 = arith.negf %49 : vector<8x128xf32>
    %51 = math.exp %50 : vector<8x128xf32>
    %cst_22 = arith.constant 1.000000e+00 : f32
    %52 = vector.broadcast %cst_22 : f32 to vector<8x128xf32>
    %53 = arith.addf %52, %51 : vector<8x128xf32>
    %54 = arith.divf %52, %53 : vector<8x128xf32>
    %55 = vector.extract_strided_slice %48 {offsets = [0, 128], sizes = [8, 128], strides = [1, 1]} : vector<8x512xf32> to vector<8x128xf32>
    %56 = arith.negf %55 : vector<8x128xf32>
    %57 = math.exp %56 : vector<8x128xf32>
    %cst_23 = arith.constant 1.000000e+00 : f32
    %58 = vector.broadcast %cst_23 : f32 to vector<8x128xf32>
    %59 = arith.addf %58, %57 : vector<8x128xf32>
    %60 = arith.divf %58, %59 : vector<8x128xf32>
    %61 = vector.extract_strided_slice %48 {offsets = [0, 256], sizes = [8, 128], strides = [1, 1]} : vector<8x512xf32> to vector<8x128xf32>
    %62 = math.tanh %61 : vector<8x128xf32>
    %63 = vector.extract_strided_slice %48 {offsets = [0, 384], sizes = [8, 128], strides = [1, 1]} : vector<8x512xf32> to vector<8x128xf32>
    %64 = arith.negf %63 : vector<8x128xf32>
    %65 = math.exp %64 : vector<8x128xf32>
    %cst_24 = arith.constant 1.000000e+00 : f32
    %66 = vector.broadcast %cst_24 : f32 to vector<8x128xf32>
    %67 = arith.addf %66, %65 : vector<8x128xf32>
    %68 = arith.divf %66, %67 : vector<8x128xf32>
    %69 = arith.mulf %60, %42 : vector<8x128xf32>
    %70 = arith.mulf %54, %62 : vector<8x128xf32>
    %71 = arith.addf %69, %70 : vector<8x128xf32>
    %72 = math.tanh %71 : vector<8x128xf32>
    %73 = arith.mulf %68, %72 : vector<8x128xf32>
    %c0_25 = arith.constant 0 : index
    %c0_26 = arith.constant 0 : index
    %c0_27 = arith.constant 0 : index
    %74 = vector.load %arg8[%c0_25, %c0_26, %c0_27] : memref<2x8x128xf32, #tpu.memory_space<vmem>>, vector<1x8x128xf32>
    %75 = vector.shape_cast %74 : vector<1x8x128xf32> to vector<8x128xf32>
    %76 = vector.shape_cast %38 : vector<8x128xf32> to vector<1x8x128xf32>
    tpu.vector_store %arg8[%c0_25, %c0_26, %c0_27], %76 {strides = array<i32>} : memref<2x8x128xf32, #tpu.memory_space<vmem>>, vector<1x8x128xf32>,
    %c0_28 = arith.constant 0 : index
    %c0_29 = arith.constant 0 : index
    %c0_30 = arith.constant 0 : index
    %77 = vector.load %arg9[%c0_28, %c0_29, %c0_30] : memref<2x8x128xf32, #tpu.memory_space<vmem>>, vector<1x8x128xf32>
    %78 = vector.shape_cast %77 : vector<1x8x128xf32> to vector<8x128xf32>
    %79 = vector.shape_cast %36 : vector<8x128xf32> to vector<1x8x128xf32>
    tpu.vector_store %arg9[%c0_28, %c0_29, %c0_30], %79 {strides = array<i32>} : memref<2x8x128xf32, #tpu.memory_space<vmem>>, vector<1x8x128xf32>,
    %c1_31 = arith.constant 1 : index
    %c0_32 = arith.constant 0 : index
    %c0_33 = arith.constant 0 : index
    %80 = vector.load %arg8[%c1_31, %c0_32, %c0_33] : memref<2x8x128xf32, #tpu.memory_space<vmem>>, vector<1x8x128xf32>
    %81 = vector.shape_cast %80 : vector<1x8x128xf32> to vector<8x128xf32>
    %82 = vector.shape_cast %73 : vector<8x128xf32> to vector<1x8x128xf32>
    tpu.vector_store %arg8[%c1_31, %c0_32, %c0_33], %82 {strides = array<i32>} : memref<2x8x128xf32, #tpu.memory_space<vmem>>, vector<1x8x128xf32>,
    %c1_34 = arith.constant 1 : index
    %c0_35 = arith.constant 0 : index
    %c0_36 = arith.constant 0 : index
    %83 = vector.load %arg9[%c1_34, %c0_35, %c0_36] : memref<2x8x128xf32, #tpu.memory_space<vmem>>, vector<1x8x128xf32>
    %84 = vector.shape_cast %83 : vector<1x8x128xf32> to vector<8x128xf32>
    %85 = vector.shape_cast %71 : vector<8x128xf32> to vector<1x8x128xf32>
    tpu.vector_store %arg9[%c1_34, %c0_35, %c0_36], %85 {strides = array<i32>} : memref<2x8x128xf32, #tpu.memory_space<vmem>>, vector<1x8x128xf32>,
    return
  }
  func.func @transform_0(%arg0: i32) -> (i32, i32) {
    %c0_i32 = arith.constant 0 : i32
    %c0_i32_0 = arith.constant 0 : i32
    %c0_i32_1 = arith.constant 0 : i32
    return %c0_i32, %c0_i32_0 : i32, i32
  }
  func.func @transform_1(%arg0: i32) -> (i32, i32) {
    %c0_i32 = arith.constant 0 : i32
    %c0_i32_0 = arith.constant 0 : i32
    %c0_i32_1 = arith.constant 0 : i32
    return %c0_i32, %c0_i32_0 : i32, i32
  }
  func.func @transform_2(%arg0: i32) -> (i32, i32) {
    %c0_i32 = arith.constant 0 : i32
    %c0_i32_0 = arith.constant 0 : i32
    %c0_i32_1 = arith.constant 0 : i32
    return %c0_i32, %c0_i32_0 : i32, i32
  }
  func.func @transform_3(%arg0: i32) -> (i32, i32) {
    %c0_i32 = arith.constant 0 : i32
    %c0_i32_0 = arith.constant 0 : i32
    %c0_i32_1 = arith.constant 0 : i32
    return %c0_i32, %c0_i32_0 : i32, i32
  }
  func.func @transform_4(%arg0: i32) -> (i32, i32) {
    %c0_i32 = arith.constant 0 : i32
    %c0_i32_0 = arith.constant 0 : i32
    %c0_i32_1 = arith.constant 0 : i32
    return %c0_i32, %c0_i32_0 : i32, i32
  }
  func.func @transform_5(%arg0: i32) -> (i32, i32) {
    %c0_i32 = arith.constant 0 : i32
    %c0_i32_0 = arith.constant 0 : i32
    %c0_i32_1 = arith.constant 0 : i32
    return %c0_i32, %c0_i32_0 : i32, i32
  }
  func.func @transform_6(%arg0: i32) -> (i32, i32) {
    %c0_i32 = arith.constant 0 : i32
    %c0_i32_0 = arith.constant 0 : i32
    %c0_i32_1 = arith.constant 0 : i32
    return %c0_i32, %c0_i32_0 : i32, i32
  }
  func.func @transform_7(%arg0: i32) -> (i32, i32, i32) {
    %c0_i32 = arith.constant 0 : i32
    %c0_i32_0 = arith.constant 0 : i32
    %c0_i32_1 = arith.constant 0 : i32
    %c0_i32_2 = arith.constant 0 : i32
    return %c0_i32, %c0_i32_0, %c0_i32_1 : i32, i32, i32
  }
  func.func @transform_8(%arg0: i32) -> (i32, i32, i32) {
    %c0_i32 = arith.constant 0 : i32
    %c0_i32_0 = arith.constant 0 : i32
    %c0_i32_1 = arith.constant 0 : i32
    %c0_i32_2 = arith.constant 0 : i32
    return %c0_i32, %c0_i32_0, %c0_i32_1 : i32, i32, i32
  }
}

</mosaic_0001>

<bundles_post_ra>
// kernel: tpu_custom_call.1
= control target key start
LH: loop header
LB: loop body
LE: loop exit
PB: predicated region body
PF: predicated region fallthrough
CT: control target
= control target key end

     0   :  { %14 = vsyncpa [#allocation4], 0  ;;  %s2044_s0 = inlined_call_operand.vmem [shape: s32[48,1], index: 0, kind: input, shape index: {}]   ;;  %s2045_s1 = inlined_call_operand.hbm [shape: f32[128,128], index: 1, kind: input, shape index: {}]   ;;  %s2046_s2 = inlined_call_operand.hbm [shape: f32[128,512], index: 2, kind: input, shape index: {}]   ;;  %s2047_s3 = inlined_call_operand.vmem [shape: f32[1,512], index: 3, kind: input, shape index: {}]   ;;  %s2048_s4 = inlined_call_operand.hbm [shape: f32[128,512], index: 4, kind: input, shape index: {}]   ;;  %s2049_s5 = inlined_call_operand.hbm [shape: f32[256,512], index: 5, kind: input, shape index: {}]   ;;  %s2050_s6 = inlined_call_operand.vmem [shape: f32[1,512], index: 6, kind: input, shape index: {}]   ;;  %s2051_s7 = inlined_call_operand.hbm [shape: f32[2,8,128], index: 7, kind: output, shape index: {0}]   ;;  %s2052_s8 = inlined_call_operand.hbm [shape: f32[2,8,128], index: 8, kind: output, shape index: {1}]  }
   0x1   :  { %15 = vsyncpa [#allocation7], 0 }
   0x2   :  { %16 = vsyncpa [#allocation10], 0 }
   0x3   :  { %17 = vsyncpa [#allocation5], 0 }
   0x4   :  { %18 = vsyncpa [#allocation13], 0  ;;  %s1821_s27 = smov 0  }
   0x5 LB: > { %s246_s30 = sshll.u32 %s2046_s2, 4  ;;  %s1830_s9 = sadd.s32 4294967295, %s1759_s27   ;;  %s1759_s27 = sphi %s1821_s27, %s24_s27   ;;  %s247_s30 = int_to_ptr.hbm [resolvable:$true] %s246_s30 }
   0x6   : > { %p1379_p0 = scmp.ge.s32.totalorder %s1759_s27, 1  ;;  %p218_p1 = scmp.lt.s32.totalorder %s1759_s27, 7 }
   0x7   : > { %p1380_p2 = scmp.ne.s32.totalorder %s1830_s9, 0  ;;  %p1487_p3 = scmp.eq.s32.totalorder %s1830_s9, 0 }
   0x8   : > { %p1836_p4 = pnand %p1379_p0, %p218_p1  ;;  %s1761_s11 = smov [#allocation6]  }
   0x9   : > { %s248_s12 = sshll.u32 %s1761_s11, 4  ;;  %s232_s15 = sshll.u32 %s2045_s1, 4  ;;  %s249_s12 = int_to_ptr.vmem [resolvable:$true] %s248_s12  ;;  %s233_s15 = int_to_ptr.hbm [resolvable:$true] %s232_s15 }
   0xa   : > { %p1474_p5 = pneg %p1836_p4  ;;  %s1762_s17 = smov [#allocation3]  }
   0xb   : > { %s234_s18 = sshll.u32 %s1762_s17, 4  ;;  %s1763_s19 = smov 512   ;;  %s235_s18 = int_to_ptr.vmem [resolvable:$true] %s234_s18 }
   0xc   : > { %p1847_p6 = pnand %p1487_p3, %p1474_p5  ;;  %s1764_s20 = smov 32  }
   0xd   : > { %s263_s23 = sshll.u32 %s2048_s4, 4  ;;  %s1765_s24 = smov 128   ;;  %s264_s23 = int_to_ptr.hbm [resolvable:$true] %s263_s23 }
   0xe   : > { %1480 = dma.hbm_to_vmem [thread:$0]  (!%p1847_p6), %s247_s30, 8192, %s249_s12, [#allocation7], %s1763_s19, %s1763_s19, %s1764_s20  }
   0xf   : > { %s1766_s25 = smov 8   ;;  %s1767_s26 = smov [#allocation8]  }
  0x10   : > { %1477 = dma.hbm_to_vmem [thread:$0]  (!%p1847_p6), %s233_s15, 2048, %s235_s18, [#allocation4], %s1765_s24, %s1765_s24, %s1766_s25  }
  0x11   : > { %s265_s28 = sshll.u32 %s1767_s26, 4  ;;  %s277_s13 = sshll.u32 %s2049_s5, 4  ;;  %s266_s28 = int_to_ptr.vmem [resolvable:$true] %s265_s28  ;;  %s278_s13 = int_to_ptr.hbm [resolvable:$true] %s277_s13 }
  0x12   : > { %1483 = dma.hbm_to_vmem [thread:$0]  (!%p1847_p6), %s264_s23, 8192, %s266_s28, [#allocation7], %s1763_s19, %s1763_s19, %s1764_s20  }
  0x13   : > { %s1768_s30 = smov [#allocation9]   ;;  %298 = sbr.rel (%p1836_p4) target bundleno = 854 (0x356), region = 48 }
  0x14   : > { %s279_s12 = sshll.u32 %s1768_s30, 4  ;;  %s280_s12 = int_to_ptr.vmem [resolvable:$true] %s279_s12 }
  0x15   : > { %1486 = dma.hbm_to_vmem [thread:$0]  (!%p1847_p6), %s278_s13, 16384, %s280_s12, [#allocation10], %s1763_s19, %s1763_s19, %s1764_s20  }
  0x18   : > { %1738 = dma.done.wait (%p1487_p3), [#allocation4], 2048  }
  0x19   : > { %1740 = vsyncadd (%p1487_p3), [#allocation4], 4294965248 }
  0x1a   : > { %1742 = dma.done.wait (%p1487_p3), [#allocation7], 16384  }
  0x1b   : > { %1744 = vsyncadd (%p1487_p3), [#allocation7], 4294950912 }
  0x1c   : > { %1746 = dma.done.wait (%p1487_p3), [#allocation10], 16384  }
  0x1d   : > { %1748 = vsyncadd (%p1487_p3), [#allocation10], 4294950912  ;;  %341 = sbr.rel (%p1380_p2) target bundleno = 469 (0x1d5), region = 68 }
  0x22   : > { %v342_v0 = vld [vmem:[%s2044_s0] sm:$0xff]  ;;  %v344_v1 = vld [vmem:[%s2044_s0 + $0x10] sm:$0xff]  ;;  %v1769_v2 = vmov 0   ;;  %v401_v4 = vld [vmem:[#allocation3 + $0x78] sm:$0xff]  ;;  %v348_v23 = vlaneseq  ;;  %v1770_v26 = vmov 1.0  }
  0x23   : > { %1522 = vset.pattern.permute.xlu0 %v1769_v2  ;;  %1523 = vset.pattern.permute.xlu1 %v1769_v2  ;;  %v346_v3 = vld [vmem:[%s2044_s0 + $0x20] sm:$0xff]  ;;  %v400_v5 = vld [vmem:[#allocation3 + $0x70] sm:$0xff]  ;;  %v399_v6 = vld [vmem:[#allocation3 + $0x68] sm:$0xff] }
  0x24   : > { %351 = vperm.xlu0 %1522, %v342_v0   ;;  %357 = vperm.xlu1 %1523, %v344_v1   ;;  %v398_v7 = vld [vmem:[#allocation3 + $0x60] sm:$0xff]  ;;  %v343_v8 = vld [vmem:[%s2044_s0 + $0x8] sm:$0xff]  ;;  %v345_v9 = vld [vmem:[%s2044_s0 + $0x18] sm:$0xff]  ;;  %v1899_v24 = vand.u32 127, %v348_v23 }
  0x25   : > { %1524 = vset.pattern.permute.xlu2 %v1769_v2  ;;  %402 = vmatpush.msra.mxu0 %v401_v4  ;;  %v397_v10 = vld [vmem:[#allocation3 + $0x58] sm:$0xff]  ;;  %v347_v11 = vld [vmem:[%s2044_s0 + $0x28] sm:$0xff]  ;;  %v396_v12 = vld [vmem:[#allocation3 + $0x50] sm:$0xff] }
  0x26   : > { %363 = vperm.xlu2 %1524, %v346_v3   ;;  %1418 = vmatpush.msra.mxu1 %v401_v4  ;;  %v395_v13 = vld [vmem:[#allocation3 + $0x48] sm:$0xff]  ;;  %v394_v14 = vld [vmem:[#allocation3 + $0x40] sm:$0xff]  ;;  %v393_v15 = vld [vmem:[#allocation3 + $0x38] sm:$0xff] }
  0x27   : > { %403 = vmatpush.msra.mxu0 %v400_v5  ;;  %v392_v16 = vld [vmem:[#allocation3 + $0x30] sm:$0xff]  ;;  %v391_v17 = vld [vmem:[#allocation3 + $0x28] sm:$0xff]  ;;  %v390_v18 = vld [vmem:[#allocation3 + $0x20] sm:$0xff] }
  0x28   : > { %1419 = vmatpush.msra.mxu1 %v400_v5  ;;  %v389_v19 = vld [vmem:[#allocation3 + $0x18] sm:$0xff]  ;;  %v388_v20 = vld [vmem:[#allocation3 + $0x10] sm:$0xff]  ;;  %v387_v21 = vld [vmem:[#allocation3 + $0x8] sm:$0xff] }
  0x29   : > { %404 = vmatpush.msra.mxu0 %v399_v6  ;;  %v386_v22 = vld [vmem:[#allocation3] sm:$0xff]  ;;  %v498_v29 = vld [vmem:[#allocation6 + $0x1e8] sm:$0xff]  ;;  %v499_v30 = vld [vmem:[#allocation6 + $0x1f0] sm:$0xff] }
  0x2a   : > { %1420 = vmatpush.msra.mxu1 %v399_v6  ;;  %v497_v28 = vld [vmem:[#allocation6 + $0x1e0] sm:$0xff]  ;;  %546 = vmatpush.msra.mxu2 %v498_v29  ;;  %v1904_v31 = vld [vmem:[#allocation6 + $0x1f8] sm:$0xff]  ;;  %v494_v33 = vld [vmem:[#allocation6 + $0x1c8] sm:$0xff] }
  0x2b   : > { %405 = vmatpush.msra.mxu0 %v398_v7  ;;  %v493_v32 = vld [vmem:[#allocation6 + $0x1c0] sm:$0xff]  ;;  %581 = vmatpush.msra.mxu3 %v499_v30  ;;  %v495_v34 = vld [vmem:[#allocation6 + $0x1d0] sm:$0xff]  ;;  %v1907_v35 = vld [vmem:[#allocation6 + $0x1d8] sm:$0xff] }
  0x2c   : > { %354 = vperm.xlu0 %1522, %v343_v8   ;;  %360 = vperm.xlu1 %1523, %v345_v9   ;;  %v489_v36 = vld [vmem:[#allocation6 + $0x1a0] sm:$0xff]  ;;  %v490_v37 = vld [vmem:[#allocation6 + $0x1a8] sm:$0xff]  ;;  %v491_v38 = vld [vmem:[#allocation6 + $0x1b0] sm:$0xff] }
  0x2d   : > { %406 = vmatpush.msra.mxu0 %v397_v10  ;;  %1421 = vmatpush.msra.mxu1 %v398_v7  ;;  %v1910_v39 = vld [vmem:[#allocation6 + $0x1b8] sm:$0xff]  ;;  %v485_v40 = vld [vmem:[#allocation6 + $0x180] sm:$0xff]  ;;  %v486_v41 = vld [vmem:[#allocation6 + $0x188] sm:$0xff] }
  0x2e   : > { %366 = vperm.xlu2 %1524, %v347_v11   ;;  %547 = vmatpush.msra.mxu2 %v494_v33  ;;  %v487_v43 = vld [vmem:[#allocation6 + $0x190] sm:$0xff]  ;;  %v1913_v44 = vld [vmem:[#allocation6 + $0x198] sm:$0xff]  ;;  %v481_v45 = vld [vmem:[#allocation6 + $0x160] sm:$0xff] }
  0x2f   : > { %407 = vmatpush.msra.mxu0 %v396_v12  ;;  %1422 = vmatpush.msra.mxu1 %v397_v10  ;;  %v482_v46 = vld [vmem:[#allocation6 + $0x168] sm:$0xff]  ;;  %v483_v47 = vld [vmem:[#allocation6 + $0x170] sm:$0xff]  ;;  %v1918_v48 = vld [vmem:[#allocation6 + $0x178] sm:$0xff] }
  0x30   : > { %582 = vmatpush.msra.mxu3 %v495_v34  ;;  %548 = vmatpush.msra.mxu2 %v490_v37  ;;  %v477_v49 = vld [vmem:[#allocation6 + $0x140] sm:$0xff]  ;;  %v478_v50 = vld [vmem:[#allocation6 + $0x148] sm:$0xff]  ;;  %v479_v51 = vld [vmem:[#allocation6 + $0x150] sm:$0xff] }
  0x31   : > { %408 = vmatpush.msra.mxu0 %v395_v13  ;;  %1423 = vmatpush.msra.mxu1 %v396_v12  ;;  %v1921_v52 = vld [vmem:[#allocation6 + $0x158] sm:$0xff]  ;;  %v473_v53 = vld [vmem:[#allocation6 + $0x120] sm:$0xff]  ;;  %v474_v54 = vld [vmem:[#allocation6 + $0x128] sm:$0xff] }
  0x32   : > { %583 = vmatpush.msra.mxu3 %v491_v38  ;;  %549 = vmatpush.msra.mxu2 %v486_v41  ;;  %v475_v55 = vld [vmem:[#allocation6 + $0x130] sm:$0xff]  ;;  %v1924_v56 = vld [vmem:[#allocation6 + $0x138] sm:$0xff]  ;;  %v469_v57 = vld [vmem:[#allocation6 + $0x100] sm:$0xff] }
  0x33   : > { %409 = vmatpush.msra.mxu0 %v394_v14  ;;  %1424 = vmatpush.msra.mxu1 %v395_v13  ;;  %v470_v59 = vld [vmem:[#allocation6 + $0x108] sm:$0xff]  ;;  %v471_v60 = vld [vmem:[#allocation6 + $0x110] sm:$0xff]  ;;  %v1929_v61 = vld [vmem:[#allocation6 + $0x118] sm:$0xff] }
  0x34   : > { %584 = vmatpush.msra.mxu3 %v487_v43  ;;  %550 = vmatpush.msra.mxu2 %v482_v46  ;;  %v465_v62 = vld [vmem:[#allocation6 + $0xe0] sm:$0xff]  ;;  %v466_v63 = vld [vmem:[#allocation6 + $0xe8] sm:$0xff]  ;;  %v467_v0 = vld [vmem:[#allocation6 + $0xf0] sm:$0xff] }
  0x35   : > { %410 = vmatpush.msra.mxu0 %v393_v15  ;;  %1425 = vmatpush.msra.mxu1 %v394_v14  ;;  %v1932_v1 = vld [vmem:[#allocation6 + $0xf8] sm:$0xff]  ;;  %v461_v2 = vld [vmem:[#allocation6 + $0xc0] sm:$0xff]  ;;  %v462_v4 = vld [vmem:[#allocation6 + $0xc8] sm:$0xff] }
  0x36   : > { %585 = vmatpush.msra.mxu3 %v483_v47  ;;  %551 = vmatpush.msra.mxu2 %v478_v50  ;;  %v463_v5 = vld [vmem:[#allocation6 + $0xd0] sm:$0xff]  ;;  %v1935_v6 = vld [vmem:[#allocation6 + $0xd8] sm:$0xff]  ;;  %v457_v7 = vld [vmem:[#allocation6 + $0xa0] sm:$0xff] }
  0x37   : > { %411 = vmatpush.msra.mxu0 %v392_v16  ;;  %1426 = vmatpush.msra.mxu1 %v393_v15  ;;  %v458_v8 = vld [vmem:[#allocation6 + $0xa8] sm:$0xff]  ;;  %v459_v9 = vld [vmem:[#allocation6 + $0xb0] sm:$0xff]  ;;  %v453_v10 = vld [vmem:[#allocation6 + $0x80] sm:$0xff] }
  0x38   : > { %586 = vmatpush.msra.mxu3 %v479_v51  ;;  %552 = vmatpush.msra.mxu2 %v474_v54  ;;  %v460_v11 = vld [vmem:[#allocation6 + $0xb8] sm:$0xff]  ;;  %v454_v12 = vld [vmem:[#allocation6 + $0x88] sm:$0xff]  ;;  %v455_v13 = vld [vmem:[#allocation6 + $0x90] sm:$0xff] }
  0x39   : > { %412 = vmatpush.msra.mxu0 %v391_v17  ;;  %1427 = vmatpush.msra.mxu1 %v392_v16  ;;  %v449_v14 = vld [vmem:[#allocation6 + $0x60] sm:$0xff]  ;;  %v456_v15 = vld [vmem:[#allocation6 + $0x98] sm:$0xff]  ;;  %v450_v16 = vld [vmem:[#allocation6 + $0x68] sm:$0xff] }
  0x3a   : > { %587 = vmatpush.msra.mxu3 %v475_v55  ;;  %553 = vmatpush.msra.mxu2 %v470_v59  ;;  %v444_v29 = vld [vmem:[#allocation6 + $0x38] sm:$0xff]  ;;  %v437_v30 = vld [vmem:[#allocation6] sm:$0xff]  ;;  %v439_v33 = vld [vmem:[#allocation6 + $0x10] sm:$0xff] }
  0x3b   : > { %413 = vmatpush.msra.mxu0 %v390_v18  ;;  %1428 = vmatpush.msra.mxu1 %v391_v17  ;;  %v451_v17 = vld [vmem:[#allocation6 + $0x70] sm:$0xff]  ;;  %v440_v34 = vld [vmem:[#allocation6 + $0x18] sm:$0xff]  ;;  %v501_v38 = vld [vmem:[%s2047_s3] sm:$0xf] }
  0x3c   : > { %588 = vmatpush.msra.mxu3 %v471_v60  ;;  %554 = vmatpush.msra.mxu2 %v466_v63  ;;  %v1964_v46 = vperm.slane %v501_v38, 2 }
  0x3d   : > { %414 = vmatpush.msra.mxu0 %v389_v19  ;;  %1429 = vmatpush.msra.mxu1 %v390_v18  ;;  %v445_v18 = vld [vmem:[#allocation6 + $0x40] sm:$0xff] }
  0x3e   : > { %589 = vmatpush.msra.mxu3 %v467_v0  ;;  %555 = vmatpush.msra.mxu2 %v462_v4 }
  0x3f   : > { %415 = vmatpush.msra.mxu0 %v388_v20  ;;  %1430 = vmatpush.msra.mxu1 %v389_v19  ;;  %v452_v19 = vld [vmem:[#allocation6 + $0x78] sm:$0xff] }
  0x40   : > { %590 = vmatpush.msra.mxu3 %v463_v5  ;;  %556 = vmatpush.msra.mxu2 %v458_v8 }
  0x41   : > { %416 = vmatpush.msra.mxu0 %v387_v21  ;;  %1431 = vmatpush.msra.mxu1 %v388_v20  ;;  %v446_v20 = vld [vmem:[#allocation6 + $0x48] sm:$0xff] }
  0x42   : > { %591 = vmatpush.msra.mxu3 %v459_v9  ;;  %557 = vmatpush.msra.mxu2 %v454_v12 }
  0x43   : > { %1432 = vmatpush.msra.mxu1 %v387_v21  ;;  %417 = vmatpush.msra.mxu0 %v386_v22  ;;  %v447_v21 = vld [vmem:[#allocation6 + $0x50] sm:$0xff] }
  0x44   : > { %592 = vmatpush.msra.mxu3 %v455_v13  ;;  %558 = vmatpush.msra.mxu2 %v450_v16  ;;  %v1771_v13 = vmov 0.0  }
  0x45   : > { %1433 = vmatpush.msra.mxu1 %v386_v22  ;;  %616 = vmatpush.msrb.mxu0 %v1904_v31  ;;  %v441_v22 = vld [vmem:[#allocation6 + $0x20] sm:$0xff]  ;;  %675 = vst [vmem:[#allocation11] sm:$0xff] %v1771_v13 }
  0x46   : > { %593 = vmatpush.msra.mxu3 %v451_v17  ;;  %559 = vmatpush.msra.mxu2 %v446_v20  ;;  %676 = vst [vmem:[#allocation11 + $0x8] sm:$0xff] %v1771_v13 }
  0x47   : > { %511 = vmatpush.msrb.mxu1 %v497_v28  ;;  %617 = vmatpush.msrb.mxu0 %v1907_v35  ;;  %v443_v28 = vld [vmem:[#allocation6 + $0x30] sm:$0xff]  ;;  %677 = vst [vmem:[#allocation12] sm:$0xff] %v1771_v13 }
  0x48   : > { %594 = vmatpush.msra.mxu3 %v447_v21  ;;  %678 = vst [vmem:[#allocation12 + $0x8] sm:$0xff] %v1771_v13 }
  0x49   : > { %512 = vmatpush.msrb.mxu1 %v493_v32  ;;  %618 = vmatpush.msrb.mxu0 %v1910_v39  ;;  %v438_v32 = vld [vmem:[#allocation6 + $0x8] sm:$0xff] }
  0x4a   : > { %595 = vmatpush.msra.mxu3 %v443_v28 }
  0x4b   : > { %513 = vmatpush.msrb.mxu1 %v489_v36  ;;  %619 = vmatpush.msrb.mxu0 %v1913_v44 }
  0x4c   : > { %596 = vmatpush.msra.mxu3 %v439_v33 }
  0x4d   : > { %514 = vmatpush.msrb.mxu1 %v485_v40  ;;  %620 = vmatpush.msrb.mxu0 %v1918_v48  ;;  %v1958_v40 = vperm.slane %v501_v38, 3 }
  0x4f   : > { %515 = vmatpush.msrb.mxu1 %v481_v45  ;;  %621 = vmatpush.msrb.mxu0 %v1921_v52  ;;  %v1962_v45 = vperm.slane %v501_v38, 1 }
  0x51   : > { %516 = vmatpush.msrb.mxu1 %v477_v49  ;;  %622 = vmatpush.msrb.mxu0 %v1924_v56 }
  0x53   : > { %517 = vmatpush.msrb.mxu1 %v473_v53  ;;  %623 = vmatpush.msrb.mxu0 %v1929_v61 }
  0x55   : > { %518 = vmatpush.msrb.mxu1 %v469_v57  ;;  %624 = vmatpush.msrb.mxu0 %v1932_v1 }
  0x57   : > { %519 = vmatpush.msrb.mxu1 %v465_v62  ;;  %625 = vmatpush.msrb.mxu0 %v1935_v6 }
  0x59   : > { %520 = vmatpush.msrb.mxu1 %v461_v2  ;;  %626 = vmatpush.msrb.mxu0 %v460_v11 }
  0x5b   : > { %521 = vmatpush.msrb.mxu1 %v457_v7  ;;  %627 = vmatpush.msrb.mxu0 %v456_v15 }
  0x5d   : > { %522 = vmatpush.msrb.mxu1 %v453_v10  ;;  %628 = vmatpush.msrb.mxu0 %v452_v19 }
  0x5f   : > { %523 = vmatpush.msrb.mxu1 %v449_v14 }
  0x61   : > { %524 = vmatpush.msrb.mxu1 %v445_v18 }
  0x63   : > { %525 = vmatpush.msrb.mxu1 %v441_v22 }
  0x65   : > { %526 = vmatpush.msrb.mxu1 %v437_v30 }
  0x80   : > { %v364_v25 = vpop.permute.xlu2 %363 }
  0x81   : > { %vm372_vm0 = vcmp.eq.s32.totalorder %v1899_v24, %v364_v25  ;;  %v448_v25 = vld [vmem:[#allocation6 + $0x58] sm:$0xff] }
  0x82   : > { %1400 = vmatmul.msk.f32.vlgmr.msra.gmra.mxu1 %vm372_vm0, %v1770_v26  ;;  %629 = vmatpush.msrb.mxu0 %v448_v25 }
  0x84   : > { %630 = vmatpush.msrb.mxu0 %v444_v29 }
  0x86   : > { %631 = vmatpush.msrb.mxu0 %v440_v34 }
  0x88   : > { %v367_v27 = vpop.permute.xlu2 %366 }
  0x89   : > { %vm373_vm1 = vcmp.eq.s32.totalorder %v1899_v24, %v367_v27  ;;  %v442_v27 = vld [vmem:[#allocation6 + $0x28] sm:$0xff] }
  0x8a   : > { %1401 = vmatmul.msk.f32.gmra.mxu1 %vm373_vm1, %v1770_v26  ;;  %560 = vmatpush.msra.mxu2 %v442_v27 }
  0x8c   : > { %561 = vmatpush.msra.mxu2 %v438_v32 }
  0x8e   : > { %1434 = vmatpush.msrb.mxu2 %v1904_v31 }
  0x90   : > { %1435 = vmatpush.msrb.mxu2 %v1907_v35 }
  0x92   : > { %1436 = vmatpush.msrb.mxu2 %v1910_v39  ;;  %v1956_v39 = vperm.slane %v501_v38, 0 }
  0x94   : > { %1437 = vmatpush.msrb.mxu2 %v1913_v44 }
  0x96   : > { %v352_v42 = vpop.permute.xlu0 %351  ;;  %v358_v3 = vpop.permute.xlu1 %357  ;;  %1438 = vmatpush.msrb.mxu2 %v1918_v48 }
  0x97   : > { %vm368_vm2 = vcmp.eq.s32.totalorder %v1899_v24, %v352_v42  ;;  %vm370_vm4 = vcmp.eq.s32.totalorder %v1899_v24, %v358_v3 }
  0x98   : > { %1396 = vmatmul.msk.f32.vlgmr.msra.gmra.mxu0 %vm368_vm2, %v1770_v26  ;;  %1439 = vmatpush.msrb.mxu2 %v1921_v52 }
  0x9a   : > { %1440 = vmatpush.msrb.mxu2 %v1924_v56 }
  0x9c   : > { %1441 = vmatpush.msrb.mxu2 %v1929_v61 }
  0x9e   : > { %v355_v58 = vpop.permute.xlu0 %354  ;;  %v361_v23 = vpop.permute.xlu1 %360  ;;  %1442 = vmatpush.msrb.mxu2 %v1932_v1 }
  0x9f   : > { %vm369_vm3 = vcmp.eq.s32.totalorder %v1899_v24, %v355_v58  ;;  %vm371_vm5 = vcmp.eq.s32.totalorder %v1899_v24, %v361_v23 }
  0xa0   : > { %1397 = vmatmul.msk.f32.gmra.mxu0 %vm369_vm3, %v1770_v26  ;;  %1443 = vmatpush.msrb.mxu2 %v1935_v6 }
  0xa2   : > { %1444 = vmatpush.msrb.mxu2 %v460_v11 }
  0xa4   : > { %1445 = vmatpush.msrb.mxu2 %v456_v15 }
  0xa6   : > { %1446 = vmatpush.msrb.mxu2 %v452_v19 }
  0xa8   : > { %1398 = vmatmul.msk.f32.gmra.mxu0 %vm370_vm4, %v1770_v26  ;;  %1447 = vmatpush.msrb.mxu2 %v448_v25 }
  0xaa   : > { %1448 = vmatpush.msrb.mxu2 %v444_v29 }
  0xac   : > { %1449 = vmatpush.msrb.mxu2 %v440_v34 }
  0xb0   : > { %1399 = vmatmul.msk.f32.gmra.mxu0 %vm371_vm5, %v1770_v26 }
  0xff   : > { %v431_v36 = vpop.f32.mrf.mxu1 }
 0x107   : > { %v434_v37 = vpop.f32.mrf.mxu1 }
 0x115   : > { %v419_v24 = vpop.f32.mrf.mxu0 }
 0x116   : > { %527 = vmatmul.f32.vlgmr.msrb.gmra.mxu1 %v419_v24  ;;  %562 = vmatmul.f32.vlgmr.msra.gmra.mxu2 %v419_v24 }
 0x117   : > { %597 = vmatmul.f32.vlgmr.msra.gmra.mxu3 %v419_v24  ;;  %632 = vmatmul.f32.vlgmr.msrb.gmra.mxu0 %v419_v24 }
 0x11d   : > { %v422_v26 = vpop.f32.mrf.mxu0 }
 0x11e   : > { %530 = vmatmul.f32.gmra.mxu1 %v422_v26  ;;  %565 = vmatmul.f32.gmra.mxu2 %v422_v26 }
 0x11f   : > { %600 = vmatmul.f32.gmra.mxu3 %v422_v26  ;;  %635 = vmatmul.f32.gmra.mxu0 %v422_v26 }
 0x125   : > { %v425_v31 = vpop.f32.mrf.mxu0 }
 0x126   : > { %533 = vmatmul.f32.gmra.mxu1 %v425_v31  ;;  %568 = vmatmul.f32.gmra.mxu2 %v425_v31 }
 0x127   : > { %603 = vmatmul.f32.gmra.mxu3 %v425_v31  ;;  %638 = vmatmul.f32.gmra.mxu0 %v425_v31 }
 0x12d   : > { %v428_v35 = vpop.f32.mrf.mxu0 }
 0x12e   : > { %536 = vmatmul.f32.gmra.mxu1 %v428_v35  ;;  %571 = vmatmul.f32.gmra.mxu2 %v428_v35 }
 0x12f   : > { %606 = vmatmul.f32.gmra.mxu3 %v428_v35  ;;  %641 = vmatmul.f32.gmra.mxu0 %v428_v35 }
 0x136   : > { %539 = vmatmul.f32.gmra.mxu1 %v431_v36  ;;  %574 = vmatmul.f32.gmra.mxu2 %v431_v36 }
 0x137   : > { %609 = vmatmul.f32.gmra.mxu3 %v431_v36 }
 0x13e   : > { %542 = vmatmul.f32.gmra.mxu1 %v434_v37  ;;  %577 = vmatmul.f32.gmra.mxu2 %v434_v37 }
 0x13f   : > { %612 = vmatmul.f32.gmra.mxu3 %v434_v37 }
 0x146   : > { %644 = vmatmul.f32.vlgmr.msrb.gmra.mxu2 %v431_v36 }
 0x14e   : > { %647 = vmatmul.f32.gmra.mxu2 %v434_v37 }
 0x193   : > { %v528_v41 = vpop.f32.mrf.mxu1 }
 0x194   : > { %v529_v42 = vadd.f32 %v528_v41, %v1956_v39  ;;  %v633_v43 = vpop.f32.mrf.mxu0 }
 0x195   : > { %v634_v44 = vadd.f32 %v633_v43, %v1958_v40 }
 0x196   : > { %651 = vst [vmem:[#allocation2] sm:$0xff] %v529_v42 }
 0x197   : > { %654 = vst [vmem:[#allocation2 + $0x18] sm:$0xff] %v634_v44 }
 0x199   : > { %v563_v47 = vpop.f32.mrf.mxu2 }
 0x19a   : > { %v564_v48 = vadd.f32 %v563_v47, %v1962_v45  ;;  %v598_v49 = vpop.f32.mrf.mxu3 }
 0x19b   : > { %v599_v50 = vadd.f32 %v598_v49, %v1964_v46  ;;  %v531_v51 = vpop.f32.mrf.mxu1 }
 0x19c   : > { %652 = vst [vmem:[#allocation2 + $0x8] sm:$0xff] %v564_v48  ;;  %v532_v52 = vadd.f32 %v531_v51, %v1956_v39  ;;  %v636_v53 = vpop.f32.mrf.mxu0 }
 0x19d   : > { %653 = vst [vmem:[#allocation2 + $0x10] sm:$0xff] %v599_v50  ;;  %v637_v54 = vadd.f32 %v636_v53, %v1958_v40 }
 0x19e   : > { %655 = vst [vmem:[#allocation2 + $0x20] sm:$0xff] %v532_v52 }
 0x19f   : > { %658 = vst [vmem:[#allocation2 + $0x38] sm:$0xff] %v637_v54 }
 0x1a1   : > { %v566_v55 = vpop.f32.mrf.mxu2 }
 0x1a2   : > { %v567_v56 = vadd.f32 %v566_v55, %v1962_v45  ;;  %v601_v57 = vpop.f32.mrf.mxu3 }
 0x1a3   : > { %v602_v58 = vadd.f32 %v601_v57, %v1964_v46  ;;  %v534_v59 = vpop.f32.mrf.mxu1 }
 0x1a4   : > { %656 = vst [vmem:[#allocation2 + $0x28] sm:$0xff] %v567_v56  ;;  %v535_v60 = vadd.f32 %v534_v59, %v1956_v39  ;;  %v639_v61 = vpop.f32.mrf.mxu0 }
 0x1a5   : > { %657 = vst [vmem:[#allocation2 + $0x30] sm:$0xff] %v602_v58  ;;  %v640_v62 = vadd.f32 %v639_v61, %v1958_v40 }
 0x1a6   : > { %659 = vst [vmem:[#allocation2 + $0x40] sm:$0xff] %v535_v60 }
 0x1a7   : > { %662 = vst [vmem:[#allocation2 + $0x58] sm:$0xff] %v640_v62 }
 0x1a9   : > { %v569_v63 = vpop.f32.mrf.mxu2 }
 0x1aa   : > { %v570_v0 = vadd.f32 %v569_v63, %v1962_v45  ;;  %v604_v1 = vpop.f32.mrf.mxu3 }
 0x1ab   : > { %v605_v2 = vadd.f32 %v604_v1, %v1964_v46  ;;  %v537_v3 = vpop.f32.mrf.mxu1 }
 0x1ac   : > { %660 = vst [vmem:[#allocation2 + $0x48] sm:$0xff] %v570_v0  ;;  %v538_v4 = vadd.f32 %v537_v3, %v1956_v39  ;;  %v642_v5 = vpop.f32.mrf.mxu0 }
 0x1ad   : > { %661 = vst [vmem:[#allocation2 + $0x50] sm:$0xff] %v605_v2  ;;  %v643_v6 = vadd.f32 %v642_v5, %v1958_v40 }
 0x1ae   : > { %663 = vst [vmem:[#allocation2 + $0x60] sm:$0xff] %v538_v4 }
 0x1af   : > { %666 = vst [vmem:[#allocation2 + $0x78] sm:$0xff] %v643_v6 }
 0x1b1   : > { %v572_v7 = vpop.f32.mrf.mxu2 }
 0x1b2   : > { %v573_v8 = vadd.f32 %v572_v7, %v1962_v45  ;;  %v607_v9 = vpop.f32.mrf.mxu3 }
 0x1b3   : > { %v608_v10 = vadd.f32 %v607_v9, %v1964_v46  ;;  %v540_v11 = vpop.f32.mrf.mxu1 }
 0x1b4   : > { %664 = vst [vmem:[#allocation2 + $0x68] sm:$0xff] %v573_v8  ;;  %v541_v12 = vadd.f32 %v540_v11, %v1956_v39 }
 0x1b5   : > { %665 = vst [vmem:[#allocation2 + $0x70] sm:$0xff] %v608_v10 }
 0x1b6   : > { %667 = vst [vmem:[#allocation2 + $0x80] sm:$0xff] %v541_v12 }
 0x1b9   : > { %v575_v14 = vpop.f32.mrf.mxu2 }
 0x1ba   : > { %v576_v15 = vadd.f32 %v575_v14, %v1962_v45  ;;  %v610_v16 = vpop.f32.mrf.mxu3 }
 0x1bb   : > { %v611_v17 = vadd.f32 %v610_v16, %v1964_v46  ;;  %v543_v18 = vpop.f32.mrf.mxu1 }
 0x1bc   : > { %668 = vst [vmem:[#allocation2 + $0x88] sm:$0xff] %v576_v15  ;;  %v544_v19 = vadd.f32 %v543_v18, %v1956_v39 }
 0x1bd   : > { %669 = vst [vmem:[#allocation2 + $0x90] sm:$0xff] %v611_v17 }
 0x1be   : > { %671 = vst [vmem:[#allocation2 + $0xa0] sm:$0xff] %v544_v19 }
 0x1c1   : > { %v578_v20 = vpop.f32.mrf.mxu2 }
 0x1c2   : > { %v579_v21 = vadd.f32 %v578_v20, %v1962_v45  ;;  %v613_v22 = vpop.f32.mrf.mxu3 }
 0x1c3   : > { %v614_v23 = vadd.f32 %v613_v22, %v1964_v46 }
 0x1c4   : > { %672 = vst [vmem:[#allocation2 + $0xa8] sm:$0xff] %v579_v21 }
 0x1c5   : > { %673 = vst [vmem:[#allocation2 + $0xb0] sm:$0xff] %v614_v23 }
 0x1c9   : > { %v645_v25 = vpop.f32.mrf.mxu2 }
 0x1ca   : > { %v646_v27 = vadd.f32 %v645_v25, %v1958_v40 }
 0x1cc   : > { %670 = vst [vmem:[#allocation2 + $0x98] sm:$0xff] %v646_v27 }
 0x1d1   : > { %v648_v28 = vpop.f32.mrf.mxu2 }
 0x1d2   : > { %v649_v29 = vadd.f32 %v648_v28, %v1958_v40 }
 0x1d4   : > { %674 = vst [vmem:[#allocation2 + $0xb8] sm:$0xff] %v649_v29 }
 0x1d5 PF: > { %v751_v30 = vld [vmem:[#allocation8 + $0x1e0] sm:$0xff]  ;;  %v752_v32 = vld [vmem:[#allocation8 + $0x1e8] sm:$0xff]  ;;  %v754_v33 = vld [vmem:[#allocation8 + $0x1f8] sm:$0xff]  ;;  %s1402_s28 = sshll.u32 %s1830_s9, 3  ;;  %s1772_s10 = smov [#allocation12]  }
 0x1d6   : > { %755 = vmatpush.msra.mxu0 %v751_v30  ;;  %775 = vmatpush.msra.mxu1 %v752_v32  ;;  %v747_v34 = vld [vmem:[#allocation8 + $0x1c0] sm:$0xff]  ;;  %v748_v24 = vld [vmem:[#allocation8 + $0x1c8] sm:$0xff]  ;;  %v750_v26 = vld [vmem:[#allocation8 + $0x1d8] sm:$0xff]  ;;  %s1989_s29 = sshra.s32 %s1402_s28, 3  ;;  %s1290_s14 = sshll.u32 %s1772_s10, 4  ;;  %s1291_s14 = int_to_ptr.vmem [resolvable:$true] %s1290_s14 }
 0x1d7   : > { %815 = vmatpush.msra.mxu3 %v754_v33  ;;  %v743_v31 = vld [vmem:[#allocation8 + $0x1a0] sm:$0xff]  ;;  %v744_v35 = vld [vmem:[#allocation8 + $0x1a8] sm:$0xff]  ;;  %v746_v36 = vld [vmem:[#allocation8 + $0x1b8] sm:$0xff]  ;;  %s1417_s11 = sshll.u32 %s1989_s29, 5  ;;  %s1292_s17 = sshll.u32 %s2052_s8, 4  ;;  %s1293_s17 = int_to_ptr.hbm [resolvable:$true] %s1292_s17 }
 0x1d8   : > { %756 = vmatpush.msra.mxu0 %v747_v34  ;;  %776 = vmatpush.msra.mxu1 %v748_v24  ;;  %v739_v37 = vld [vmem:[#allocation8 + $0x180] sm:$0xff]  ;;  %v740_v38 = vld [vmem:[#allocation8 + $0x188] sm:$0xff]  ;;  %v742_v39 = vld [vmem:[#allocation8 + $0x198] sm:$0xff]  ;;  %s1992_s13 = scalar_lea.vmem [#allocation2], %s1417_s11  ;;  %p1495_p7 = scmp.eq.s32.totalorder %s1830_s9, 5 }
 0x1d9   : > { %816 = vmatpush.msra.mxu3 %v750_v26  ;;  %v735_v40 = vld [vmem:[#allocation8 + $0x160] sm:$0xff]  ;;  %v736_v41 = vld [vmem:[#allocation8 + $0x168] sm:$0xff]  ;;  %v738_v42 = vld [vmem:[#allocation8 + $0x178] sm:$0xff]  ;;  %s1773_s18 = smov 128   ;;  %s1774_s19 = smov 8  }
 0x1da   : > { %757 = vmatpush.msra.mxu0 %v743_v31  ;;  %777 = vmatpush.msra.mxu1 %v744_v35  ;;  %v731_v43 = vld [vmem:[#allocation8 + $0x140] sm:$0xff]  ;;  %v732_v44 = vld [vmem:[#allocation8 + $0x148] sm:$0xff]  ;;  %v753_v45 = vld [vmem:[#allocation8 + $0x1f0] sm:$0xff]  ;;  %s1775_s20 = smov [#allocation11]   ;;  %s1278_s24 = sshll.u32 %s2051_s7, 4  ;;  %s1279_s24 = int_to_ptr.hbm [resolvable:$true] %s1278_s24 }
 0x1db   : > { %817 = vmatpush.msra.mxu3 %v746_v36  ;;  %v734_v46 = vld [vmem:[#allocation8 + $0x158] sm:$0xff]  ;;  %v749_v47 = vld [vmem:[#allocation8 + $0x1d0] sm:$0xff]  ;;  %v727_v48 = vld [vmem:[#allocation8 + $0x120] sm:$0xff]  ;;  %795 = vmatpush.msra.mxu2 %v753_v45  ;;  %s1276_s21 = sshll.u32 %s1775_s20, 4  ;;  %s1277_s21 = int_to_ptr.vmem [resolvable:$true] %s1276_s21 }
 0x1dc   : > { %758 = vmatpush.msra.mxu0 %v739_v37  ;;  %778 = vmatpush.msra.mxu1 %v740_v38  ;;  %v728_v49 = vld [vmem:[#allocation8 + $0x128] sm:$0xff]  ;;  %v730_v50 = vld [vmem:[#allocation8 + $0x138] sm:$0xff]  ;;  %v745_v51 = vld [vmem:[#allocation8 + $0x1b0] sm:$0xff] }
 0x1dd   : > { %818 = vmatpush.msra.mxu3 %v742_v39  ;;  %v723_v52 = vld [vmem:[#allocation8 + $0x100] sm:$0xff]  ;;  %v724_v53 = vld [vmem:[#allocation8 + $0x108] sm:$0xff]  ;;  %796 = vmatpush.msra.mxu2 %v749_v47  ;;  %v726_v54 = vld [vmem:[#allocation8 + $0x118] sm:$0xff] }
 0x1de   : > { %759 = vmatpush.msra.mxu0 %v735_v40  ;;  %779 = vmatpush.msra.mxu1 %v736_v41  ;;  %v741_v55 = vld [vmem:[#allocation8 + $0x190] sm:$0xff]  ;;  %v719_v56 = vld [vmem:[#allocation8 + $0xe0] sm:$0xff]  ;;  %v720_v57 = vld [vmem:[#allocation8 + $0xe8] sm:$0xff] }
 0x1df   : > { %819 = vmatpush.msra.mxu3 %v738_v42  ;;  %797 = vmatpush.msra.mxu2 %v745_v51  ;;  %v722_v58 = vld [vmem:[#allocation8 + $0xf8] sm:$0xff]  ;;  %v737_v59 = vld [vmem:[#allocation8 + $0x170] sm:$0xff]  ;;  %v715_v60 = vld [vmem:[#allocation8 + $0xc0] sm:$0xff] }
 0x1e0   : > { %760 = vmatpush.msra.mxu0 %v731_v43  ;;  %780 = vmatpush.msra.mxu1 %v732_v44  ;;  %v716_v61 = vld [vmem:[#allocation8 + $0xc8] sm:$0xff]  ;;  %v718_v62 = vld [vmem:[#allocation8 + $0xd8] sm:$0xff]  ;;  %v733_v63 = vld [vmem:[#allocation8 + $0x150] sm:$0xff] }
 0x1e1   : > { %820 = vmatpush.msra.mxu3 %v734_v46  ;;  %798 = vmatpush.msra.mxu2 %v741_v55  ;;  %v711_v0 = vld [vmem:[#allocation8 + $0xa0] sm:$0xff]  ;;  %v712_v1 = vld [vmem:[#allocation8 + $0xa8] sm:$0xff]  ;;  %v714_v2 = vld [vmem:[#allocation8 + $0xb8] sm:$0xff] }
 0x1e2   : > { %761 = vmatpush.msra.mxu0 %v727_v48  ;;  %781 = vmatpush.msra.mxu1 %v728_v49  ;;  %v729_v3 = vld [vmem:[#allocation8 + $0x130] sm:$0xff]  ;;  %v707_v4 = vld [vmem:[#allocation8 + $0x80] sm:$0xff]  ;;  %v708_v5 = vld [vmem:[#allocation8 + $0x88] sm:$0xff] }
 0x1e3   : > { %821 = vmatpush.msra.mxu3 %v730_v50  ;;  %799 = vmatpush.msra.mxu2 %v737_v59  ;;  %v710_v6 = vld [vmem:[#allocation8 + $0x98] sm:$0xff]  ;;  %v725_v7 = vld [vmem:[#allocation8 + $0x110] sm:$0xff]  ;;  %v703_v8 = vld [vmem:[#allocation8 + $0x60] sm:$0xff] }
 0x1e4   : > { %762 = vmatpush.msra.mxu0 %v723_v52  ;;  %782 = vmatpush.msra.mxu1 %v724_v53  ;;  %v704_v9 = vld [vmem:[#allocation8 + $0x68] sm:$0xff]  ;;  %v706_v10 = vld [vmem:[#allocation8 + $0x78] sm:$0xff]  ;;  %v721_v11 = vld [vmem:[#allocation8 + $0xf0] sm:$0xff] }
 0x1e5   : > { %822 = vmatpush.msra.mxu3 %v726_v54  ;;  %800 = vmatpush.msra.mxu2 %v733_v63  ;;  %v699_v12 = vld [vmem:[#allocation8 + $0x40] sm:$0xff]  ;;  %v700_v13 = vld [vmem:[#allocation8 + $0x48] sm:$0xff]  ;;  %v702_v14 = vld [vmem:[#allocation8 + $0x58] sm:$0xff] }
 0x1e6   : > { %763 = vmatpush.msra.mxu0 %v719_v56  ;;  %783 = vmatpush.msra.mxu1 %v720_v57  ;;  %v717_v15 = vld [vmem:[#allocation8 + $0xd0] sm:$0xff]  ;;  %v695_v16 = vld [vmem:[#allocation8 + $0x20] sm:$0xff]  ;;  %v696_v17 = vld [vmem:[#allocation8 + $0x28] sm:$0xff] }
 0x1e7   : > { %823 = vmatpush.msra.mxu3 %v722_v58  ;;  %801 = vmatpush.msra.mxu2 %v729_v3  ;;  %v698_v18 = vld [vmem:[#allocation8 + $0x38] sm:$0xff]  ;;  %v713_v19 = vld [vmem:[#allocation8 + $0xb0] sm:$0xff]  ;;  %v691_v20 = vld [vmem:[#allocation8] sm:$0xff] }
 0x1e8   : > { %764 = vmatpush.msra.mxu0 %v715_v60  ;;  %784 = vmatpush.msra.mxu1 %v716_v61  ;;  %v692_v21 = vld [vmem:[#allocation8 + $0x8] sm:$0xff]  ;;  %v694_v22 = vld [vmem:[#allocation8 + $0x18] sm:$0xff]  ;;  %v689_v23 = vld [vmem:[#allocation11] sm:$0xff] }
 0x1e9   : > { %824 = vmatpush.msra.mxu3 %v718_v62  ;;  %802 = vmatpush.msra.mxu2 %v725_v7  ;;  %v709_v25 = vld [vmem:[#allocation8 + $0x90] sm:$0xff]  ;;  %v966_v27 = vld [vmem:[#allocation9 + $0x1e0] sm:$0xff]  ;;  %v1031_v29 = vld [vmem:[#allocation9 + $0x3e8] sm:$0xff] }
 0x1ea   : > { %765 = vmatpush.msra.mxu0 %v711_v0  ;;  %785 = vmatpush.msra.mxu1 %v712_v1  ;;  %v1030_v28 = vld [vmem:[#allocation9 + $0x3e0] sm:$0xff]  ;;  %v705_v30 = vld [vmem:[#allocation8 + $0x70] sm:$0xff]  ;;  %v1027_v34 = vld [vmem:[#allocation9 + $0x3c8] sm:$0xff] }
 0x1eb   : > { %825 = vmatpush.msra.mxu3 %v714_v2  ;;  %803 = vmatpush.msra.mxu2 %v721_v11  ;;  %v962_v32 = vld [vmem:[#allocation9 + $0x1c0] sm:$0xff]  ;;  %v701_v24 = vld [vmem:[#allocation8 + $0x50] sm:$0xff]  ;;  %v1023_v35 = vld [vmem:[#allocation9 + $0x3a8] sm:$0xff] }
 0x1ec   : > { %766 = vmatpush.msra.mxu0 %v707_v4  ;;  %786 = vmatpush.msra.mxu1 %v708_v5  ;;  %v1026_v33 = vld [vmem:[#allocation9 + $0x3c0] sm:$0xff]  ;;  %v697_v36 = vld [vmem:[#allocation8 + $0x30] sm:$0xff]  ;;  %v1019_v39 = vld [vmem:[#allocation9 + $0x388] sm:$0xff] }
 0x1ed   : > { %826 = vmatpush.msra.mxu3 %v710_v6  ;;  %804 = vmatpush.msra.mxu2 %v717_v15  ;;  %v958_v26 = vld [vmem:[#allocation9 + $0x1a0] sm:$0xff]  ;;  %v693_v40 = vld [vmem:[#allocation8 + $0x10] sm:$0xff]  ;;  %v967_v42 = vld [vmem:[#allocation9 + $0x1e8] sm:$0xff] }
 0x1ee   : > { %767 = vmatpush.msra.mxu0 %v703_v8  ;;  %787 = vmatpush.msra.mxu1 %v704_v9  ;;  %v1022_v31 = vld [vmem:[#allocation9 + $0x3a0] sm:$0xff]  ;;  %v963_v43 = vld [vmem:[#allocation9 + $0x1c8] sm:$0xff] }
 0x1ef   : > { %827 = vmatpush.msra.mxu3 %v706_v10  ;;  %805 = vmatpush.msra.mxu2 %v713_v19  ;;  %v954_v37 = vld [vmem:[#allocation9 + $0x180] sm:$0xff]  ;;  %v959_v44 = vld [vmem:[#allocation9 + $0x1a8] sm:$0xff] }
 0x1f0   : > { %768 = vmatpush.msra.mxu0 %v699_v12  ;;  %788 = vmatpush.msra.mxu1 %v700_v13  ;;  %v1018_v38 = vld [vmem:[#allocation9 + $0x380] sm:$0xff]  ;;  %v955_v45 = vld [vmem:[#allocation9 + $0x188] sm:$0xff] }
 0x1f1   : > { %828 = vmatpush.msra.mxu3 %v702_v14  ;;  %806 = vmatpush.msra.mxu2 %v709_v25  ;;  %v950_v41 = vld [vmem:[#allocation9 + $0x160] sm:$0xff]  ;;  %v951_v46 = vld [vmem:[#allocation9 + $0x168] sm:$0xff] }
 0x1f2   : > { %769 = vmatpush.msra.mxu0 %v695_v16  ;;  %789 = vmatpush.msra.mxu1 %v696_v17  ;;  %v946_v47 = vld [vmem:[#allocation9 + $0x140] sm:$0xff]  ;;  %v947_v49 = vld [vmem:[#allocation9 + $0x148] sm:$0xff] }
 0x1f3   : > { %829 = vmatpush.msra.mxu3 %v698_v18  ;;  %807 = vmatpush.msra.mxu2 %v705_v30  ;;  %v1014_v48 = vld [vmem:[#allocation9 + $0x360] sm:$0xff]  ;;  %v1015_v50 = vld [vmem:[#allocation9 + $0x368] sm:$0xff]  ;;  %v969_v30 = vld [vmem:[#allocation9 + $0x1f8] sm:$0xff] }
 0x1f4   : > { %770 = vmatpush.msra.mxu0 %v691_v20  ;;  %790 = vmatpush.msra.mxu1 %v692_v21  ;;  %v942_v51 = vld [vmem:[#allocation9 + $0x120] sm:$0xff]  ;;  %v943_v53 = vld [vmem:[#allocation9 + $0x128] sm:$0xff] }
 0x1f5   : > { %830 = vmatpush.msra.mxu3 %v694_v22  ;;  %771 = vmatmul.f32.vlgmr.msra.gmra.mxu0 %v689_v23  ;;  %v1010_v52 = vld [vmem:[#allocation9 + $0x340] sm:$0xff]  ;;  %v1011_v54 = vld [vmem:[#allocation9 + $0x348] sm:$0xff] }
 0x1f6   : > { %791 = vmatmul.f32.vlgmr.msra.gmra.mxu1 %v689_v23  ;;  %831 = vmatmul.f32.vlgmr.msra.gmra.mxu3 %v689_v23  ;;  %v938_v55 = vld [vmem:[#allocation9 + $0x100] sm:$0xff]  ;;  %v939_v57 = vld [vmem:[#allocation9 + $0x108] sm:$0xff] }
 0x1f7   : > { %1044 = vmatpush.msrb.mxu0 %v966_v27  ;;  %1064 = vmatpush.msrb.mxu1 %v1030_v28  ;;  %v1006_v56 = vld [vmem:[#allocation9 + $0x320] sm:$0xff]  ;;  %v1007_v58 = vld [vmem:[#allocation9 + $0x328] sm:$0xff] }
 0x1f8   : > { %1104 = vmatpush.msrb.mxu3 %v1031_v29  ;;  %808 = vmatpush.msra.mxu2 %v701_v24  ;;  %v934_v59 = vld [vmem:[#allocation9 + $0xe0] sm:$0xff]  ;;  %v935_v61 = vld [vmem:[#allocation9 + $0xe8] sm:$0xff]  ;;  %v968_v29 = vld [vmem:[#allocation9 + $0x1f0] sm:$0xff] }
 0x1f9   : > { %1045 = vmatpush.msrb.mxu0 %v962_v32  ;;  %1065 = vmatpush.msrb.mxu1 %v1026_v33  ;;  %v1002_v60 = vld [vmem:[#allocation9 + $0x300] sm:$0xff]  ;;  %v1003_v62 = vld [vmem:[#allocation9 + $0x308] sm:$0xff]  ;;  %v1032_v24 = vld [vmem:[#allocation9 + $0x3f0] sm:$0xff] }
 0x1fa   : > { %1105 = vmatpush.msrb.mxu3 %v1027_v34  ;;  %809 = vmatpush.msra.mxu2 %v697_v36  ;;  %v930_v63 = vld [vmem:[#allocation9 + $0xc0] sm:$0xff]  ;;  %v931_v1 = vld [vmem:[#allocation9 + $0xc8] sm:$0xff]  ;;  %v964_v34 = vld [vmem:[#allocation9 + $0x1d0] sm:$0xff] }
 0x1fb   : > { %1046 = vmatpush.msrb.mxu0 %v958_v26  ;;  %1066 = vmatpush.msrb.mxu1 %v1022_v31  ;;  %v998_v0 = vld [vmem:[#allocation9 + $0x2e0] sm:$0xff]  ;;  %v999_v2 = vld [vmem:[#allocation9 + $0x2e8] sm:$0xff]  ;;  %v965_v26 = vld [vmem:[#allocation9 + $0x1d8] sm:$0xff] }
 0x1fc   : > { %1106 = vmatpush.msrb.mxu3 %v1023_v35  ;;  %810 = vmatpush.msra.mxu2 %v693_v40  ;;  %v926_v3 = vld [vmem:[#allocation9 + $0xa0] sm:$0xff]  ;;  %v927_v5 = vld [vmem:[#allocation9 + $0xa8] sm:$0xff]  ;;  %v1033_v31 = vld [vmem:[#allocation9 + $0x3f8] sm:$0xff] }
 0x1fd   : > { %1047 = vmatpush.msrb.mxu0 %v954_v37  ;;  %1067 = vmatpush.msrb.mxu1 %v1018_v38  ;;  %v994_v4 = vld [vmem:[#allocation9 + $0x2c0] sm:$0xff]  ;;  %v995_v6 = vld [vmem:[#allocation9 + $0x2c8] sm:$0xff]  ;;  %v960_v35 = vld [vmem:[#allocation9 + $0x1b0] sm:$0xff] }
 0x1fe   : > { %1107 = vmatpush.msrb.mxu3 %v1019_v39  ;;  %811 = vmatmul.f32.vlgmr.msra.gmra.mxu2 %v689_v23  ;;  %v922_v7 = vld [vmem:[#allocation9 + $0x80] sm:$0xff]  ;;  %v923_v9 = vld [vmem:[#allocation9 + $0x88] sm:$0xff]  ;;  %v1028_v36 = vld [vmem:[#allocation9 + $0x3d0] sm:$0xff] }
 0x1ff   : > { %1048 = vmatpush.msrb.mxu0 %v950_v41  ;;  %1084 = vmatpush.msrb.mxu2 %v967_v42  ;;  %v990_v8 = vld [vmem:[#allocation9 + $0x2a0] sm:$0xff]  ;;  %v991_v10 = vld [vmem:[#allocation9 + $0x2a8] sm:$0xff]  ;;  %v961_v37 = vld [vmem:[#allocation9 + $0x1b8] sm:$0xff] }
 0x200   : > { %1068 = vmatpush.msrb.mxu1 %v1014_v48  ;;  %1108 = vmatpush.msrb.mxu3 %v1015_v50  ;;  %v918_v11 = vld [vmem:[#allocation9 + $0x60] sm:$0xff]  ;;  %v919_v13 = vld [vmem:[#allocation9 + $0x68] sm:$0xff]  ;;  %v1029_v38 = vld [vmem:[#allocation9 + $0x3d8] sm:$0xff] }
 0x201   : > { %1085 = vmatpush.msrb.mxu2 %v963_v43  ;;  %1049 = vmatpush.msrb.mxu0 %v946_v47  ;;  %v986_v12 = vld [vmem:[#allocation9 + $0x280] sm:$0xff]  ;;  %v987_v14 = vld [vmem:[#allocation9 + $0x288] sm:$0xff]  ;;  %v956_v39 = vld [vmem:[#allocation9 + $0x190] sm:$0xff] }
 0x202   : > { %1069 = vmatpush.msrb.mxu1 %v1010_v52  ;;  %1109 = vmatpush.msrb.mxu3 %v1011_v54  ;;  %v914_v15 = vld [vmem:[#allocation9 + $0x40] sm:$0xff]  ;;  %v915_v17 = vld [vmem:[#allocation9 + $0x48] sm:$0xff]  ;;  %v1024_v40 = vld [vmem:[#allocation9 + $0x3b0] sm:$0xff] }
 0x203   : > { %1086 = vmatpush.msrb.mxu2 %v959_v44  ;;  %1050 = vmatpush.msrb.mxu0 %v942_v51  ;;  %v982_v16 = vld [vmem:[#allocation9 + $0x260] sm:$0xff]  ;;  %v983_v18 = vld [vmem:[#allocation9 + $0x268] sm:$0xff]  ;;  %v957_v41 = vld [vmem:[#allocation9 + $0x198] sm:$0xff] }
 0x204   : > { %1070 = vmatpush.msrb.mxu1 %v1006_v56  ;;  %1110 = vmatpush.msrb.mxu3 %v1007_v58  ;;  %v910_v19 = vld [vmem:[#allocation9 + $0x20] sm:$0xff]  ;;  %v911_v21 = vld [vmem:[#allocation9 + $0x28] sm:$0xff]  ;;  %v1025_v43 = vld [vmem:[#allocation9 + $0x3b8] sm:$0xff] }
 0x205   : > { %1087 = vmatpush.msrb.mxu2 %v955_v45  ;;  %1051 = vmatpush.msrb.mxu0 %v938_v55  ;;  %v978_v20 = vld [vmem:[#allocation9 + $0x240] sm:$0xff]  ;;  %v979_v22 = vld [vmem:[#allocation9 + $0x248] sm:$0xff]  ;;  %v952_v44 = vld [vmem:[#allocation9 + $0x170] sm:$0xff] }
 0x206   : > { %1071 = vmatpush.msrb.mxu1 %v1002_v60  ;;  %1111 = vmatpush.msrb.mxu3 %v1003_v62  ;;  %v906_v23 = vld [vmem:[#allocation9] sm:$0xff]  ;;  %v907_v27 = vld [vmem:[#allocation9 + $0x8] sm:$0xff]  ;;  %v1020_v45 = vld [vmem:[#allocation9 + $0x390] sm:$0xff] }
 0x207   : > { %1088 = vmatpush.msrb.mxu2 %v951_v46  ;;  %1052 = vmatpush.msrb.mxu0 %v934_v59  ;;  %v974_v25 = vld [vmem:[#allocation9 + $0x220] sm:$0xff]  ;;  %v975_v28 = vld [vmem:[#allocation9 + $0x228] sm:$0xff]  ;;  %v953_v46 = vld [vmem:[#allocation9 + $0x178] sm:$0xff] }
 0x208   : > { %1072 = vmatpush.msrb.mxu1 %v998_v0  ;;  %1112 = vmatpush.msrb.mxu3 %v999_v2  ;;  %v970_v32 = vld [vmem:[#allocation9 + $0x200] sm:$0xff]  ;;  %v971_v33 = vld [vmem:[#allocation9 + $0x208] sm:$0xff]  ;;  %v1021_v48 = vld [vmem:[#allocation9 + $0x398] sm:$0xff] }
 0x209   : > { %1089 = vmatpush.msrb.mxu2 %v947_v49  ;;  %1053 = vmatpush.msrb.mxu0 %v930_v63  ;;  %v685_v42 = vld [vmem:[%s1992_s13] sm:$0xff]  ;;  %v686_v47 = vld [vmem:[%s1992_s13 + $0x8] sm:$0xff]  ;;  %v948_v50 = vld [vmem:[#allocation9 + $0x150] sm:$0xff] }
 0x20a   : > { %1073 = vmatpush.msrb.mxu1 %v994_v4  ;;  %1113 = vmatpush.msrb.mxu3 %v995_v6  ;;  %v1016_v51 = vld [vmem:[#allocation9 + $0x370] sm:$0xff]  ;;  %v949_v52 = vld [vmem:[#allocation9 + $0x158] sm:$0xff] }
 0x20b   : > { %1090 = vmatpush.msrb.mxu2 %v943_v53  ;;  %1054 = vmatpush.msrb.mxu0 %v926_v3  ;;  %v1017_v55 = vld [vmem:[#allocation9 + $0x378] sm:$0xff]  ;;  %v1012_v58 = vld [vmem:[#allocation9 + $0x350] sm:$0xff] }
 0x20c   : > { %1074 = vmatpush.msrb.mxu1 %v990_v8  ;;  %1114 = vmatpush.msrb.mxu3 %v991_v10  ;;  %v945_v59 = vld [vmem:[#allocation9 + $0x138] sm:$0xff]  ;;  %v940_v0 = vld [vmem:[#allocation9 + $0x110] sm:$0xff] }
 0x20d   : > { %1091 = vmatpush.msrb.mxu2 %v939_v57  ;;  %1055 = vmatpush.msrb.mxu0 %v922_v7  ;;  %v944_v57 = vld [vmem:[#allocation9 + $0x130] sm:$0xff]  ;;  %v1013_v62 = vld [vmem:[#allocation9 + $0x358] sm:$0xff] }
 0x20e   : > { %1075 = vmatpush.msrb.mxu1 %v986_v12  ;;  %1115 = vmatpush.msrb.mxu3 %v987_v14  ;;  %v941_v2 = vld [vmem:[#allocation9 + $0x118] sm:$0xff]  ;;  %v936_v4 = vld [vmem:[#allocation9 + $0xf0] sm:$0xff] }
 0x20f   : > { %1092 = vmatpush.msrb.mxu2 %v935_v61  ;;  %1056 = vmatpush.msrb.mxu0 %v918_v11  ;;  %v688_v61 = vld [vmem:[%s1992_s13 + $0x18] sm:$0xff]  ;;  %v932_v8 = vld [vmem:[#allocation9 + $0xd0] sm:$0xff] }
 0x210   : > { %1076 = vmatpush.msrb.mxu1 %v982_v16  ;;  %1116 = vmatpush.msrb.mxu3 %v983_v18  ;;  %v1009_v3 = vld [vmem:[#allocation9 + $0x338] sm:$0xff]  ;;  %v1000_v10 = vld [vmem:[#allocation9 + $0x2f0] sm:$0xff] }
 0x211   : > { %1093 = vmatpush.msrb.mxu2 %v931_v1  ;;  %1057 = vmatpush.msrb.mxu0 %v914_v15  ;;  %v1008_v1 = vld [vmem:[#allocation9 + $0x330] sm:$0xff]  ;;  %v937_v6 = vld [vmem:[#allocation9 + $0xf8] sm:$0xff] }
 0x212   : > { %1077 = vmatpush.msrb.mxu1 %v978_v20  ;;  %1117 = vmatpush.msrb.mxu3 %v979_v22  ;;  %v1005_v7 = vld [vmem:[#allocation9 + $0x318] sm:$0xff]  ;;  %v928_v14 = vld [vmem:[#allocation9 + $0xb0] sm:$0xff] }
 0x213   : > { %1094 = vmatpush.msrb.mxu2 %v927_v5  ;;  %1058 = vmatpush.msrb.mxu0 %v910_v19  ;;  %v1004_v5 = vld [vmem:[#allocation9 + $0x310] sm:$0xff]  ;;  %v933_v11 = vld [vmem:[#allocation9 + $0xd8] sm:$0xff] }
 0x214   : > { %1078 = vmatpush.msrb.mxu1 %v974_v25  ;;  %1118 = vmatpush.msrb.mxu3 %v975_v28  ;;  %v1001_v12 = vld [vmem:[#allocation9 + $0x2f8] sm:$0xff]  ;;  %v996_v15 = vld [vmem:[#allocation9 + $0x2d0] sm:$0xff] }
 0x215   : > { %1095 = vmatpush.msrb.mxu2 %v923_v9  ;;  %1059 = vmatpush.msrb.mxu0 %v906_v23  ;;  %v929_v16 = vld [vmem:[#allocation9 + $0xb8] sm:$0xff]  ;;  %v924_v19 = vld [vmem:[#allocation9 + $0x90] sm:$0xff] }
 0x216   : > { %1079 = vmatpush.msrb.mxu1 %v970_v32  ;;  %1119 = vmatpush.msrb.mxu3 %v971_v33  ;;  %v992_v20 = vld [vmem:[#allocation9 + $0x2b0] sm:$0xff]  ;;  %v925_v22 = vld [vmem:[#allocation9 + $0x98] sm:$0xff] }
 0x217   : > { %1096 = vmatpush.msrb.mxu2 %v919_v13  ;;  %1124 = vmatpush.msra.mxu0 %v968_v29  ;;  %v993_v23 = vld [vmem:[#allocation9 + $0x2b8] sm:$0xff]  ;;  %v920_v29 = vld [vmem:[#allocation9 + $0x70] sm:$0xff] }
 0x218   : > { %1144 = vmatpush.msra.mxu1 %v1032_v24  ;;  %1184 = vmatpush.msra.mxu3 %v1033_v31  ;;  %v921_v32 = vld [vmem:[#allocation9 + $0x78] sm:$0xff]  ;;  %v687_v24 = vld [vmem:[%s1992_s13 + $0x10] sm:$0xff] }
 0x219   : > { %1097 = vmatpush.msrb.mxu2 %v915_v17  ;;  %1125 = vmatpush.msra.mxu0 %v964_v34  ;;  %v997_v17 = vld [vmem:[#allocation9 + $0x2d8] sm:$0xff]  ;;  %v903_v34 = vld [vmem:[#allocation11 + $0x8] sm:$0xff]  ;;  %v984_v31 = vld [vmem:[#allocation9 + $0x270] sm:$0xff] }
 0x21a   : > { %1145 = vmatpush.msra.mxu1 %v1028_v36  ;;  %1185 = vmatpush.msra.mxu3 %v1029_v38  ;;  %v989_v33 = vld [vmem:[#allocation9 + $0x298] sm:$0xff]  ;;  %v912_v38 = vld [vmem:[#allocation9 + $0x30] sm:$0xff] }
 0x21b   : > { %1098 = vmatpush.msrb.mxu2 %v911_v21  ;;  %1126 = vmatpush.msra.mxu0 %v960_v35  ;;  %v917_v35 = vld [vmem:[#allocation9 + $0x58] sm:$0xff] }
 0x21c   : > { %1146 = vmatpush.msra.mxu1 %v1024_v40  ;;  %1186 = vmatpush.msra.mxu3 %v1025_v43  ;;  %v985_v36 = vld [vmem:[#allocation9 + $0x278] sm:$0xff] }
 0x21d   : > { %1099 = vmatpush.msrb.mxu2 %v907_v27  ;;  %1127 = vmatpush.msra.mxu0 %v956_v39  ;;  %v980_v39 = vld [vmem:[#allocation9 + $0x250] sm:$0xff]  ;;  %v981_v43 = vld [vmem:[#allocation9 + $0x258] sm:$0xff] }
 0x21e   : > { %1147 = vmatpush.msra.mxu1 %v1020_v45  ;;  %1187 = vmatpush.msra.mxu3 %v1021_v48  ;;  %v908_v45 = vld [vmem:[#allocation9 + $0x10] sm:$0xff]  ;;  %v909_v48 = vld [vmem:[#allocation9 + $0x18] sm:$0xff] }
 0x21f   : > { %1164 = vmatpush.msra.mxu2 %v969_v30  ;;  %1128 = vmatpush.msra.mxu0 %v952_v44  ;;  %v988_v30 = vld [vmem:[#allocation9 + $0x290] sm:$0xff] }
 0x220   : > { %1148 = vmatpush.msra.mxu1 %v1016_v51  ;;  %1188 = vmatpush.msra.mxu3 %v1017_v55 }
 0x221   : > { %1165 = vmatpush.msra.mxu2 %v965_v26  ;;  %1129 = vmatpush.msra.mxu0 %v948_v50  ;;  %v916_v26 = vld [vmem:[#allocation9 + $0x50] sm:$0xff] }
 0x222   : > { %1149 = vmatpush.msra.mxu1 %v1012_v58  ;;  %1189 = vmatpush.msra.mxu3 %v1013_v62 }
 0x223   : > { %1166 = vmatpush.msra.mxu2 %v961_v37  ;;  %1130 = vmatpush.msra.mxu0 %v944_v57 }
 0x224   : > { %1150 = vmatpush.msra.mxu1 %v1008_v1  ;;  %1190 = vmatpush.msra.mxu3 %v1009_v3 }
 0x225   : > { %1167 = vmatpush.msra.mxu2 %v957_v41  ;;  %1131 = vmatpush.msra.mxu0 %v940_v0 }
 0x226   : > { %1151 = vmatpush.msra.mxu1 %v1004_v5  ;;  %1191 = vmatpush.msra.mxu3 %v1005_v7 }
 0x227   : > { %1168 = vmatpush.msra.mxu2 %v953_v46  ;;  %1132 = vmatpush.msra.mxu0 %v936_v4  ;;  %v976_v46 = vld [vmem:[#allocation9 + $0x230] sm:$0xff] }
 0x228   : > { %1152 = vmatpush.msra.mxu1 %v1000_v10  ;;  %1192 = vmatpush.msra.mxu3 %v1001_v12 }
 0x229   : > { %1169 = vmatpush.msra.mxu2 %v949_v52  ;;  %1133 = vmatpush.msra.mxu0 %v932_v8  ;;  %v972_v52 = vld [vmem:[#allocation9 + $0x210] sm:$0xff] }
 0x22a   : > { %1153 = vmatpush.msra.mxu1 %v996_v15  ;;  %1193 = vmatpush.msra.mxu3 %v997_v17 }
 0x22b   : > { %1170 = vmatpush.msra.mxu2 %v945_v59  ;;  %1134 = vmatpush.msra.mxu0 %v928_v14 }
 0x22c   : > { %1154 = vmatpush.msra.mxu1 %v992_v20  ;;  %1194 = vmatpush.msra.mxu3 %v993_v23 }
 0x22d   : > { %1171 = vmatpush.msra.mxu2 %v941_v2  ;;  %1135 = vmatpush.msra.mxu0 %v924_v19 }
 0x22e   : > { %1155 = vmatpush.msra.mxu1 %v988_v30  ;;  %1195 = vmatpush.msra.mxu3 %v989_v33 }
 0x22f   : > { %1172 = vmatpush.msra.mxu2 %v937_v6  ;;  %1136 = vmatpush.msra.mxu0 %v920_v29  ;;  %v690_v6 = vld [vmem:[#allocation12] sm:$0xff] }
 0x230   : > { %1080 = vmatmul.f32.vlgmr.msrb.gmra.mxu1 %v903_v34  ;;  %1120 = vmatmul.f32.vlgmr.msrb.gmra.mxu3 %v903_v34 }
 0x231   : > { %1173 = vmatpush.msra.mxu2 %v933_v11  ;;  %1137 = vmatpush.msra.mxu0 %v916_v26 }
 0x232   : > { %1156 = vmatpush.msra.mxu1 %v984_v31  ;;  %1196 = vmatpush.msra.mxu3 %v985_v36 }
 0x233   : > { %1174 = vmatpush.msra.mxu2 %v929_v16  ;;  %1138 = vmatpush.msra.mxu0 %v912_v38 }
 0x234   : > { %1157 = vmatpush.msra.mxu1 %v980_v39  ;;  %1197 = vmatpush.msra.mxu3 %v981_v43 }
 0x235   : > { %1175 = vmatpush.msra.mxu2 %v925_v22  ;;  %1139 = vmatpush.msra.mxu0 %v908_v45 }
 0x236   : > { %1158 = vmatpush.msra.mxu1 %v976_v46 }
 0x237   : > { %1176 = vmatpush.msra.mxu2 %v921_v32 }
 0x238   : > { %1159 = vmatpush.msra.mxu1 %v972_v52 }
 0x239   : > { %1177 = vmatpush.msra.mxu2 %v917_v35  ;;  %1160 = vmatmul.f32.vlgmr.msra.gmra.mxu1 %v903_v34 }
 0x272   : > { %v772_v49 = vpop.f32.mrf.mxu0 }
 0x273   : > { %v835_v53 = vadd.f32 %v772_v49, %v685_v42  ;;  %v792_v54 = vpop.f32.mrf.mxu1  ;;  %v913_v42 = vld [vmem:[#allocation9 + $0x38] sm:$0xff] }
 0x274   : > { %v836_v56 = vadd.f32 %v792_v54, %v686_v47  ;;  %v977_v49 = vld [vmem:[#allocation9 + $0x238] sm:$0xff]  ;;  %1178 = vmatpush.msra.mxu2 %v913_v42 }
 0x275   : > { %v1405_v60 = vmul.f32 -1.442695, %v835_v53  ;;  %v973_v54 = vld [vmem:[#allocation9 + $0x218] sm:$0xff]  ;;  %1198 = vmatpush.msra.mxu3 %v977_v49 }
 0x276   : > { %v1406_v63 = vmul.f32 -1.442695, %v836_v56  ;;  %1179 = vmatpush.msra.mxu2 %v909_v48 }
 0x277   : > { %1525 = vpow2.f32 %v1405_v60  ;;  %1199 = vmatpush.msra.mxu3 %v973_v54 }
 0x278   : > { %1527 = vpow2.f32 %v1406_v63  ;;  %1200 = vmatmul.f32.vlgmr.msra.gmra.mxu3 %v903_v34 }
 0x279   : > { %v832_v9 = vpop.f32.mrf.mxu3 }
 0x27a   : > { %v838_v13 = vadd.f32 %v832_v9, %v688_v61 }
 0x27c   : > { %v1407_v18 = vmul.f32 -1.442695, %v838_v13 }
 0x27d   : > { %v1526_v21 = vpop.eup %1525 }
 0x27e   : > { %v1528_v25 = vpop.eup %1527  ;;  %v1997_v27 = vadd.f32 1.0, %v1526_v21  ;;  %1529 = vpow2.f32 %v1407_v18 }
 0x27f   : > { %v1999_v28 = vadd.f32 1.0, %v1528_v25  ;;  %v1034_v25 = vld [vmem:[%s2050_s6] sm:$0xf] }
 0x280   : > { %1531 = vrcp.f32 %v1997_v27  ;;  %v854_v57 = vand.u32 2147483648, %v1997_v27  ;;  %v852_v60 = vand.u32 2147483647, %v1997_v27  ;;  %vm848_vm8 = vweird.f32 %v1997_v27 }
 0x281   : > { %1533 = vrcp.f32 %v1999_v28  ;;  %v812_v37 = vpop.f32.mrf.mxu2  ;;  %v873_v58 = vand.u32 2147483648, %v1999_v28  ;;  %v871_v62 = vand.u32 2147483647, %v1999_v28  ;;  %vm867_vm9 = vweird.f32 %v1999_v28 }
 0x282   : > { %v837_v41 = vadd.f32 %v812_v37, %v687_v24  ;;  %v855_v3 = vor.u32 1.1754944e-38, %v854_v57  ;;  %vm853_vm12 = vcmp.eq.f32.partialorder %v852_v60, 8.507059e+37  ;;  %v1037_v33 = vperm.slane %v1034_v25, 1 }
 0x283   : > { %v874_v5 = vor.u32 1.1754944e-38, %v873_v58  ;;  %vm872_vm13 = vcmp.eq.f32.partialorder %v871_v62, 8.507059e+37  ;;  %v1039_v37 = vperm.slane %v1034_v25, 3 }
 0x284   : > { %v1530_v40 = vpop.eup %1529 }
 0x285   : > { %v2004_v44 = vadd.f32 1.0, %v1530_v40 }
 0x286   : > { %v1532_v47 = vpop.eup %1531 }
 0x287   : > { %v1534_v50 = vpop.eup %1533  ;;  %v844_v51 = vmul.f32 %v1532_v47, %v1997_v27  ;;  %1535 = vrcp.f32 %v2004_v44  ;;  %vm849_vm6 = vweird.f32 %v1532_v47  ;;  %v893_v17 = vand.u32 2147483648, %v2004_v44 }
 0x288   : > { %v863_v53 = vmul.f32 %v1534_v50, %v1999_v28  ;;  %1537 = vtanh.f32 %v837_v41  ;;  %vm868_vm7 = vweird.f32 %v1534_v50  ;;  %vm850_vm10 = vmor %vm848_vm8, %vm849_vm6  ;;  %vm887_vm15 = vweird.f32 %v2004_v44 }
 0x289   : > { %v845_v55 = vsub.f32 1.0, %v844_v51  ;;  %vm869_vm11 = vmor %vm867_vm9, %vm868_vm7  ;;  %v891_v18 = vand.u32 2147483647, %v2004_v44  ;;  %v894_v20 = vor.u32 1.1754944e-38, %v893_v17  ;;  %v1036_v27 = vperm.slane %v1034_v25, 0 }
 0x28a   : > { %v864_v56 = vsub.f32 1.0, %v863_v53 }
 0x28b   : > { %v846_v59 = vmul.f32 %v1532_v47, %v845_v55  ;;  %vm892_vm1 = vcmp.eq.f32.partialorder %v891_v18, 8.507059e+37 }
 0x28c   : > { %v865_v61 = vmul.f32 %v1534_v50, %v864_v56 }
 0x28d   : > { %v1536_v63 = vpop.eup %1535  ;;  %v847_v0 = vadd.f32 %v1532_v47, %v846_v59 }
 0x28e   : > { %v1538_v1 = vpop.eup %1537  ;;  %v883_v2 = vmul.f32 %v1536_v63, %v2004_v44  ;;  %v866_v4 = vadd.f32 %v1534_v50, %v865_v61  ;;  %vm888_vm14 = vweird.f32 %v1536_v63 }
 0x28f   : > { %v851_v7 = vsel %vm850_vm10, %v1532_v47, %v847_v0  ;;  %vm889_vm0 = vmor %vm887_vm15, %vm888_vm14  ;;  %v1038_v47 = vperm.slane %v1034_v25, 2 }
 0x290   : > { %v884_v8 = vsub.f32 1.0, %v883_v2  ;;  %v856_v9 = vsel %vm853_vm12, %v855_v3, %v851_v7  ;;  %v870_v10 = vsel %vm869_vm11, %v1534_v50, %v866_v4 }
 0x291   : > { %v875_v11 = vsel %vm872_vm13, %v874_v5, %v870_v10  ;;  %v898_v12 = vmul.f32 %v1538_v1, %v856_v9 }
 0x292   : > { %v885_v13 = vmul.f32 %v1536_v63, %v884_v8  ;;  %v897_v14 = vmul.f32 %v875_v11, %v690_v6  ;;  %v905_v8 = vld [vmem:[#allocation12 + $0x8] sm:$0xff] }
 0x294   : > { %v899_v15 = vadd.f32 %v898_v12, %v897_v14  ;;  %v886_v16 = vadd.f32 %v1536_v63, %v885_v13 }
 0x296   : > { %1539 = vtanh.f32 %v899_v15  ;;  %1268 = vst [vmem:[#allocation12] sm:$0xff] %v899_v15  ;;  %v890_v19 = vsel %vm889_vm0, %v1536_v63, %v886_v16 }
 0x297   : > { %v895_v22 = vsel %vm892_vm1, %v894_v20, %v890_v19 }
 0x29c   : > { %v1540_v21 = vpop.eup %1539 }
 0x29d   : > { %v901_v23 = vmul.f32 %v1540_v21, %v895_v22 }
 0x29f   : > { %1060 = vmatmul.f32.vlgmr.msrb.gmra.mxu0 %v901_v23  ;;  %1267 = vst [vmem:[#allocation11] sm:$0xff] %v901_v23  ;;  %1100 = vmatmul.f32.vlgmr.msrb.gmra.mxu2 %v901_v23 }
 0x2a7   : > { %1140 = vmatmul.f32.vlgmr.msra.gmra.mxu0 %v901_v23  ;;  %1180 = vmatmul.f32.vlgmr.msra.gmra.mxu2 %v901_v23 }
 0x2ad   : > { %v1081_v29 = vpop.f32.mrf.mxu1 }
 0x2b3   : > { %v1121_v34 = vpop.f32.mrf.mxu3 }
 0x2b6   : > { %v1161_v53 = vpop.f32.mrf.mxu1 }
 0x2fb   : > { %v1201_v41 = vpop.f32.mrf.mxu3 }
 0x31c   : > { %v1061_v28 = vpop.f32.mrf.mxu0 }
 0x31d   : > { %v1062_v30 = vadd.f32 %v1061_v28, %v1036_v27 }
 0x31f   : > { %v1082_v32 = vadd.f32 %v1081_v29, %v1062_v30 }
 0x321   : > { %v1408_v24 = vmul.f32 -1.442695, %v1082_v32 }
 0x322   : > { %v1101_v26 = vpop.f32.mrf.mxu2 }
 0x323   : > { %1541 = vpow2.f32 %v1408_v24  ;;  %v1102_v31 = vadd.f32 %v1101_v26, %v1037_v33 }
 0x324   : > { %v1141_v48 = vpop.f32.mrf.mxu0 }
 0x325   : > { %v1122_v35 = vadd.f32 %v1121_v34, %v1102_v31  ;;  %v1142_v51 = vadd.f32 %v1141_v48, %v1038_v47 }
 0x327   : > { %v1409_v36 = vmul.f32 -1.442695, %v1122_v35  ;;  %v1162_v57 = vadd.f32 %v1161_v53, %v1142_v51 }
 0x329   : > { %v1542_v38 = vpop.eup %1541  ;;  %1543 = vpow2.f32 %v1409_v36 }
 0x32a   : > { %v1207_v39 = vadd.f32 1.0, %v1542_v38  ;;  %v1181_v40 = vpop.f32.mrf.mxu2 }
 0x32b   : > { %v1182_v42 = vadd.f32 %v1181_v40, %v1039_v37 }
 0x32c   : > { %1545 = vrcp.f32 %v1207_v39  ;;  %v1219_v61 = vand.u32 2147483648, %v1207_v39  ;;  %vm1213_vm3 = vweird.f32 %v1207_v39  ;;  %v1217_v63 = vand.u32 2147483647, %v1207_v39 }
 0x32d   : > { %v1202_v43 = vadd.f32 %v1201_v41, %v1182_v42 }
 0x32e   : > { %v1220_v4 = vor.u32 1.1754944e-38, %v1219_v61  ;;  %vm1218_vm7 = vcmp.eq.f32.partialorder %v1217_v63, 8.507059e+37 }
 0x32f   : > { %v1544_v44 = vpop.eup %1543  ;;  %v1410_v45 = vmul.f32 -1.442695, %v1202_v43 }
 0x330   : > { %v1226_v46 = vadd.f32 1.0, %v1544_v44 }
 0x331   : > { %1547 = vpow2.f32 %v1410_v45 }
 0x332   : > { %v1546_v49 = vpop.eup %1545  ;;  %1549 = vrcp.f32 %v1226_v46  ;;  %v1238_v0 = vand.u32 2147483648, %v1226_v46  ;;  %v1236_v3 = vand.u32 2147483647, %v1226_v46  ;;  %vm1232_vm6 = vweird.f32 %v1226_v46 }
 0x333   : > { %v1209_v50 = vmul.f32 %v1546_v49, %v1207_v39  ;;  %vm1214_vm2 = vweird.f32 %v1546_v49 }
 0x334   : > { %vm1215_vm4 = vmor %vm1213_vm3, %vm1214_vm2  ;;  %v1239_v7 = vor.u32 1.1754944e-38, %v1238_v0  ;;  %vm1237_vm9 = vcmp.eq.f32.partialorder %v1236_v3, 8.507059e+37 }
 0x335   : > { %v1210_v52 = vsub.f32 1.0, %v1209_v50 }
 0x337   : > { %v1548_v54 = vpop.eup %1547  ;;  %v1211_v55 = vmul.f32 %v1546_v49, %v1210_v52 }
 0x338   : > { %v1550_v56 = vpop.eup %1549  ;;  %v1246_v58 = vadd.f32 1.0, %v1548_v54 }
 0x339   : > { %v1228_v59 = vmul.f32 %v1550_v56, %v1226_v46  ;;  %v1212_v60 = vadd.f32 %v1546_v49, %v1211_v55  ;;  %vm1233_vm5 = vweird.f32 %v1550_v56 }
 0x33a   : > { %1551 = vrcp.f32 %v1246_v58  ;;  %vm1234_vm8 = vmor %vm1232_vm6, %vm1233_vm5  ;;  %v1258_v20 = vand.u32 2147483648, %v1246_v58  ;;  %vm1252_vm11 = vweird.f32 %v1246_v58  ;;  %v1256_v21 = vand.u32 2147483647, %v1246_v58 }
 0x33b   : > { %v1229_v62 = vsub.f32 1.0, %v1228_v59  ;;  %1553 = vtanh.f32 %v1162_v57  ;;  %v1216_v2 = vsel %vm1215_vm4, %v1546_v49, %v1212_v60 }
 0x33c   : > { %v1221_v9 = vsel %vm1218_vm7, %v1220_v4, %v1216_v2  ;;  %v1259_v23 = vor.u32 1.1754944e-38, %v1258_v20  ;;  %vm1257_vm13 = vcmp.eq.f32.partialorder %v1256_v21, 8.507059e+37 }
 0x33d   : > { %v1230_v1 = vmul.f32 %v1550_v56, %v1229_v62 }
 0x33f   : > { %v1231_v5 = vadd.f32 %v1550_v56, %v1230_v1 }
 0x340   : > { %v1552_v6 = vpop.eup %1551 }
 0x341   : > { %v1235_v10 = vsel %vm1234_vm8, %v1550_v56, %v1231_v5  ;;  %v1248_v11 = vmul.f32 %v1552_v6, %v1246_v58  ;;  %v1554_v12 = vpop.eup %1553  ;;  %vm1253_vm10 = vweird.f32 %v1552_v6 }
 0x342   : > { %v1240_v13 = vsel %vm1237_vm9, %v1239_v7, %v1235_v10  ;;  %v1263_v15 = vmul.f32 %v1554_v12, %v1221_v9  ;;  %vm1254_vm12 = vmor %vm1252_vm11, %vm1253_vm10 }
 0x343   : > { %v1262_v14 = vmul.f32 %v1240_v13, %v905_v8  ;;  %v1249_v16 = vsub.f32 1.0, %v1248_v11 }
 0x345   : > { %v1264_v17 = vadd.f32 %v1263_v15, %v1262_v14  ;;  %v1250_v18 = vmul.f32 %v1552_v6, %v1249_v16 }
 0x347   : > { %1555 = vtanh.f32 %v1264_v17  ;;  %1270 = vst [vmem:[#allocation12 + $0x8] sm:$0xff] %v1264_v17  ;;  %v1251_v19 = vadd.f32 %v1552_v6, %v1250_v18 }
 0x348   : > { %1469 = dma.vmem_to_hbm [thread:$0]  (%p1495_p7), %s1291_s14, 256, %s1293_s17, [#allocation13], %s1773_s18, %s1773_s18, %s1774_s19  }
 0x349   : > { %v1255_v22 = vsel %vm1254_vm12, %v1552_v6, %v1251_v19 }
 0x34a   : > { %v1260_v27 = vsel %vm1257_vm13, %v1259_v23, %v1255_v22 }
 0x34d   : > { %v1556_v25 = vpop.eup %1555 }
 0x34e   : > { %v1266_v28 = vmul.f32 %v1556_v25, %v1260_v27 }
 0x350   : > { %1269 = vst [vmem:[#allocation11 + $0x8] sm:$0xff] %v1266_v28 }
 0x351   : > { %1467 = dma.vmem_to_hbm [thread:$0]  (%p1495_p7), %s1277_s21, 256, %s1279_s24, [#allocation5], %s1773_s18, %s1773_s18, %s1774_s19  }
 0x352   : > { %1750 = dma.done.wait (%p1495_p7), [#allocation5], 256  }
 0x353   : > { %1752 = vsyncadd (%p1495_p7), [#allocation5], 4294967040 }
 0x354   : > { %1754 = dma.done.wait (%p1495_p7), [#allocation13], 256  }
 0x355   : > { %1756 = vsyncadd (%p1495_p7), [#allocation13], 4294967040 }
 0x356 PF: > { %s24_s27 = sadd.s32 1, %s1759_s27  }
 0x357   : > { %p21_p8 = scmp.ge.s32.totalorder %s24_s27, 8  }
 0x359   :  { %23 = sbr.rel (!%p21_p8) target bundleno = 5 (0x5), region = 104 }
 0x35e   :  { %1314 = vsyncpa [#allocation4], 1 }
 0x35f   :  { %1316 = vsyncpa [#allocation4 + $0x1], 1 }
 0x360   :  { %1317 = vsyncpa [#allocation7], 1 }
 0x361   :  { %1318 = vsyncpa [#allocation10], 1 }
 0x362   :  { %1319 = vsyncpa [#allocation5], 1 }
 0x363   :  { %1321 = vsyncpa [#allocation5 + $0x1], 1 }
 0x364   :  { %1322 = vsyncpa [#allocation13], 1 }

</bundles_post_ra>
